<compile_context>
chip_gen: v6e
topology: v6e:2x2x1
jax: 0.10.0
libtpu: 0.0.40
codegen_flags: <defaults>
</compile_context>

<pallas_src>
import jax
import jax.numpy as jnp
from jax.experimental import pallas as pl
from jax.experimental.pallas import tpu as pltpu

IN_DIM = 32 * 32 * 3          # 3072
H1, H2, H3, OUT = 256, 128, 64, 10
H3_PAD = 128                  # pad the 64-wide layer-3 output to a full lane width
OUT_PAD = 128                 # pad the 10-wide logits to a full lane width


def _round_up(n, m):
    return (n + m - 1) // m * m


def _chip_config():
    """Generation-gate tile size / VMEM budget.

    Returns (tm_max, vmem_limit_bytes, small_vmem_chip)."""
    vmem_cap = 64 << 20  # conservative fallback: assume v7x-like 64 MiB / TC
    try:
        vmem_cap = int(pltpu.get_tpu_info().vmem_capacity_bytes)
    except Exception:
        pass
    if vmem_cap >= (96 << 20):
        # v5e / v6e: 128 MiB physical VMEM -> big batch tiles, 64 MiB scoped limit.
        return 1024, 64 << 20, False
    # v7x-like: 64 MiB VMEM per TC and 2 TCs -> smaller f32 x tiles, <=48 MiB limit.
    return 512, 40 << 20, True


def mlp_kernel(x_ref, w1_ref, b1_ref, w2_ref, b2_ref,
               w3_ref, b3_ref, w4_ref, b4_ref, o_ref):
    # In-kernel f32 -> bf16 cast (VPU) feeding the MXU; x is streamed from HBM
    # exactly once as f32 instead of being cast+rewritten by a wrapper pass.
    x = x_ref[...].astype(jnp.bfloat16)
    h = jnp.dot(x, w1_ref[...], preferred_element_type=jnp.float32) + b1_ref[...]
    h = jnp.maximum(h, 0.0).astype(jnp.bfloat16)
    h = jnp.dot(h, w2_ref[...], preferred_element_type=jnp.float32) + b2_ref[...]
    h = jnp.maximum(h, 0.0).astype(jnp.bfloat16)
    h = jnp.dot(h, w3_ref[...], preferred_element_type=jnp.float32) + b3_ref[...]
    h = jnp.maximum(h, 0.0).astype(jnp.bfloat16)
    logits = jnp.dot(h, w4_ref[...], preferred_element_type=jnp.float32) + b4_ref[...]
    o_ref[...] = logits.astype(o_ref.dtype)   # bf16 lane-dense store


def mlp_classifier_forward(x_nchw, params):
    """x_nchw: (B, 3, 32, 32) float32.  Returns logits (B, 10) float32."""
    B = x_nchw.shape[0]
    x = x_nchw.reshape(B, IN_DIM)  # nn.Flatten() (row-major, same as torch)

    tm_max, vmem_limit, small_vmem = _chip_config()

    # Batch tiling: minimal padding (<= 15 dead rows per tile); on 2-TC chips
    # force >= 2 grid steps when the batch is big enough so both cores work.
    n_tiles = max(1, -(-B // tm_max))
    if small_vmem and B >= 32:
        n_tiles = max(n_tiles, 2)
    TM = _round_up(-(-B // n_tiles), 16)     # multiple of 16 (bf16 sublane packing)
    B_pad = n_tiles * TM
    x_p = jnp.pad(x, ((0, B_pad - B), (0, 0)))   # pad only; cast happens in-kernel

    (w1, b1), (w2, b2), (w3, b3), (w4, b4) = params
    w1b = w1.astype(jnp.bfloat16)
    w2b = w2.astype(jnp.bfloat16)
    # Pad layer-3 output (64 -> 128) and layer-4 input/output to full lane widths.
    w3p = jnp.zeros((H2, H3_PAD), jnp.bfloat16).at[:, :H3].set(w3.astype(jnp.bfloat16))
    b3p = jnp.zeros((1, H3_PAD), jnp.float32).at[0, :H3].set(b3.astype(jnp.float32))
    w4p = jnp.zeros((H3_PAD, OUT_PAD), jnp.bfloat16).at[:H3, :OUT].set(w4.astype(jnp.bfloat16))
    b4p = jnp.zeros((1, OUT_PAD), jnp.float32).at[0, :OUT].set(b4.astype(jnp.float32))
    b1r = b1.reshape(1, H1).astype(jnp.float32)
    b2r = b2.reshape(1, H2).astype(jnp.float32)

    def tiled(shape):
        # x / out: tiled along the batch grid axis (auto double-buffered DMA).
        return pl.BlockSpec(shape, lambda i: (i, 0))

    def resident(shape):
        # Weights / biases: constant index_map -> DMA'd once, stay VMEM-resident.
        return pl.BlockSpec(shape, lambda i: (0, 0))

    flops = 2 * B_pad * (IN_DIM * H1 + H1 * H2 + H2 * H3_PAD + H3_PAD * OUT_PAD)
    bytes_accessed = (
        B_pad * IN_DIM * 4                                       # x (f32, cast in-kernel)
        + (IN_DIM * H1 + H1 * H2 + H2 * H3_PAD + H3_PAD * OUT_PAD) * 2  # weights (bf16)
        + (H1 + H2 + H3_PAD + OUT_PAD) * 4                       # biases (f32)
        + B_pad * OUT_PAD * 2                                    # output (bf16)
    )

    out = pl.pallas_call(
        mlp_kernel,
        out_shape=jax.ShapeDtypeStruct((B_pad, OUT_PAD), jnp.bfloat16),
        grid=(n_tiles,),
        in_specs=[
            tiled((TM, IN_DIM)),
            resident((IN_DIM, H1)),  resident((1, H1)),
            resident((H1, H2)),      resident((1, H2)),
            resident((H2, H3_PAD)),  resident((1, H3_PAD)),
            resident((H3_PAD, OUT_PAD)), resident((1, OUT_PAD)),
        ],
        out_specs=tiled((TM, OUT_PAD)),
        compiler_params=pltpu.CompilerParams(
            dimension_semantics=("parallel",),
            vmem_limit_bytes=vmem_limit,
        ),
        cost_estimate=pl.CostEstimate(
            flops=flops, bytes_accessed=bytes_accessed, transcendentals=0),
    )(x_p, w1b, b1r, w2b, b2r, w3p, b3p, w4p, b4p)

    # Keep this slice immediately after the call: cols 10..127 are zero padding.
    return out[:B, :OUT].astype(jnp.float32)


def init_params(key):
    """Deterministic init mimicking torch.nn.Linear (uniform +-1/sqrt(fan_in)).
    Weights stored as (in, out)."""
    dims = [(IN_DIM, H1), (H1, H2), (H2, H3), (H3, OUT)]
    params = []
    for i, (fan_in, fan_out) in enumerate(dims):
        kw, kb = jax.random.split(jax.random.fold_in(key, i))
        bound = 1.0 / (fan_in ** 0.5)
        w = jax.random.uniform(kw, (fan_in, fan_out), jnp.float32, -bound, bound)
        b = jax.random.uniform(kb, (fan_out,), jnp.float32, -bound, bound)
        params.append((w, b))
    return params


def reference_forward(x_nchw, params):
    """Pure-JAX reference with the same bf16-in / f32-accumulate / bf16-out recipe."""
    x = x_nchw.reshape(x_nchw.shape[0], IN_DIM).astype(jnp.bfloat16)
    (w1, b1), (w2, b2), (w3, b3), (w4, b4) = params
    h = jnp.dot(x, w1.astype(jnp.bfloat16), preferred_element_type=jnp.float32) + b1
    h = jnp.maximum(h, 0.0).astype(jnp.bfloat16)
    h = jnp.dot(h, w2.astype(jnp.bfloat16), preferred_element_type=jnp.float32) + b2
    h = jnp.maximum(h, 0.0).astype(jnp.bfloat16)
    h = jnp.dot(h, w3.astype(jnp.bfloat16), preferred_element_type=jnp.float32) + b3
    h = jnp.maximum(h, 0.0).astype(jnp.bfloat16)
    out = jnp.dot(h, w4.astype(jnp.bfloat16), preferred_element_type=jnp.float32) + b4
    return out.astype(jnp.bfloat16).astype(jnp.float32)


if __name__ == "__main__":
    key = jax.random.PRNGKey(0)
    k_x, k_p = jax.random.split(key)

    B = 4
    x = jax.random.normal(k_x, (B, 3, 32, 32), jnp.float32)  # NCHW like PyTorch
    params = init_params(k_p)

    logits = mlp_classifier_forward(x, params)
    logits = jax.block_until_ready(logits)

    ref = reference_forward(x, params)
    assert logits.shape == (B, 10)
    assert jnp.allclose(logits, ref, atol=3e-2, rtol=3e-2), "mismatch vs reference"

    print("KERNEL_OK")
</pallas_src>

<mosaic_0001>
module attributes {stable_mosaic.version = 11 : i64} {
  func.func @mlp_kernel(%arg0: i32, %arg1: memref<16x3072xf32, #tpu.memory_space<vmem>>, %arg2: memref<3072x256xbf16, #tpu.memory_space<vmem>>, %arg3: memref<1x256xf32, #tpu.memory_space<vmem>>, %arg4: memref<256x128xbf16, #tpu.memory_space<vmem>>, %arg5: memref<1x128xf32, #tpu.memory_space<vmem>>, %arg6: memref<128x128xbf16, #tpu.memory_space<vmem>>, %arg7: memref<1x128xf32, #tpu.memory_space<vmem>>, %arg8: memref<128x128xbf16, #tpu.memory_space<vmem>>, %arg9: memref<1x128xf32, #tpu.memory_space<vmem>>, %arg10: memref<16x128xbf16, #tpu.memory_space<vmem>>) attributes {dimension_semantics = [#tpu.dimension_semantics<parallel>], iteration_bounds = array<i64: 1>, scalar_prefetch = 0 : i64, scratch_operands = 0 : i64, tpu.core_type = #tpu.core_type<tc>, window_params = [{transform_indices = @transform_0, window_bounds = array<i64: 16, 3072>}, {pipeline_mode = #tpu.pipeline_mode<synchronous>, transform_indices = @transform_1, window_bounds = array<i64: 3072, 256>}, {pipeline_mode = #tpu.pipeline_mode<synchronous>, transform_indices = @transform_2, window_bounds = array<i64: 1, 256>}, {pipeline_mode = #tpu.pipeline_mode<synchronous>, transform_indices = @transform_3, window_bounds = array<i64: 256, 128>}, {pipeline_mode = #tpu.pipeline_mode<synchronous>, transform_indices = @transform_4, window_bounds = array<i64: 1, 128>}, {pipeline_mode = #tpu.pipeline_mode<synchronous>, transform_indices = @transform_5, window_bounds = array<i64: 128, 128>}, {pipeline_mode = #tpu.pipeline_mode<synchronous>, transform_indices = @transform_6, window_bounds = array<i64: 1, 128>}, {pipeline_mode = #tpu.pipeline_mode<synchronous>, transform_indices = @transform_7, window_bounds = array<i64: 128, 128>}, {pipeline_mode = #tpu.pipeline_mode<synchronous>, transform_indices = @transform_8, window_bounds = array<i64: 1, 128>}, {transform_indices = @transform_9, window_bounds = array<i64: 16, 128>}]} {
    %c0 = arith.constant 0 : index
    %c0_0 = arith.constant 0 : index
    %0 = vector.load %arg1[%c0, %c0_0] : memref<16x3072xf32, #tpu.memory_space<vmem>>, vector<16x3072xf32>
    %1 = arith.truncf %0 : vector<16x3072xf32> to vector<16x3072xbf16>
    %c0_1 = arith.constant 0 : index
    %c0_2 = arith.constant 0 : index
    %2 = vector.load %arg2[%c0_1, %c0_2] : memref<3072x256xbf16, #tpu.memory_space<vmem>>, vector<3072x256xbf16>
    %cst = arith.constant dense<0.000000e+00> : vector<16x256xf32>
    %3 = tpu.matmul %1, %2, %cst {dimension_numbers = #tpu.dot_dimension_numbers<[1], [0], [0], [1], [0, 0, 1, 1], [], []>} : vector<16x3072xbf16>, vector<3072x256xbf16>, vector<16x256xf32> -> vector<16x256xf32>
    %c0_3 = arith.constant 0 : index
    %c0_4 = arith.constant 0 : index
    %4 = vector.load %arg3[%c0_3, %c0_4] : memref<1x256xf32, #tpu.memory_space<vmem>>, vector<1x256xf32>
    %5 = vector.broadcast %4 : vector<1x256xf32> to vector<16x256xf32>
    %6 = arith.addf %3, %5 : vector<16x256xf32>
    %cst_5 = arith.constant 0.000000e+00 : f32
    %7 = vector.broadcast %cst_5 : f32 to vector<16x256xf32>
    %8 = arith.maximumf %6, %7 : vector<16x256xf32>
    %9 = arith.truncf %8 : vector<16x256xf32> to vector<16x256xbf16>
    %c0_6 = arith.constant 0 : index
    %c0_7 = arith.constant 0 : index
    %10 = vector.load %arg4[%c0_6, %c0_7] : memref<256x128xbf16, #tpu.memory_space<vmem>>, vector<256x128xbf16>
    %cst_8 = arith.constant dense<0.000000e+00> : vector<16x128xf32>
    %11 = tpu.matmul %9, %10, %cst_8 {dimension_numbers = #tpu.dot_dimension_numbers<[1], [0], [0], [1], [0, 0, 1, 1], [], []>} : vector<16x256xbf16>, vector<256x128xbf16>, vector<16x128xf32> -> vector<16x128xf32>
    %c0_9 = arith.constant 0 : index
    %c0_10 = arith.constant 0 : index
    %12 = vector.load %arg5[%c0_9, %c0_10] : memref<1x128xf32, #tpu.memory_space<vmem>>, vector<1x128xf32>
    %13 = vector.broadcast %12 : vector<1x128xf32> to vector<16x128xf32>
    %14 = arith.addf %11, %13 : vector<16x128xf32>
    %cst_11 = arith.constant 0.000000e+00 : f32
    %15 = vector.broadcast %cst_11 : f32 to vector<16x128xf32>
    %16 = arith.maximumf %14, %15 : vector<16x128xf32>
    %17 = arith.truncf %16 : vector<16x128xf32> to vector<16x128xbf16>
    %c0_12 = arith.constant 0 : index
    %c0_13 = arith.constant 0 : index
    %18 = vector.load %arg6[%c0_12, %c0_13] : memref<128x128xbf16, #tpu.memory_space<vmem>>, vector<128x128xbf16>
    %cst_14 = arith.constant dense<0.000000e+00> : vector<16x128xf32>
    %19 = tpu.matmul %17, %18, %cst_14 {dimension_numbers = #tpu.dot_dimension_numbers<[1], [0], [0], [1], [0, 0, 1, 1], [], []>} : vector<16x128xbf16>, vector<128x128xbf16>, vector<16x128xf32> -> vector<16x128xf32>
    %c0_15 = arith.constant 0 : index
    %c0_16 = arith.constant 0 : index
    %20 = vector.load %arg7[%c0_15, %c0_16] : memref<1x128xf32, #tpu.memory_space<vmem>>, vector<1x128xf32>
    %21 = vector.broadcast %20 : vector<1x128xf32> to vector<16x128xf32>
    %22 = arith.addf %19, %21 : vector<16x128xf32>
    %cst_17 = arith.constant 0.000000e+00 : f32
    %23 = vector.broadcast %cst_17 : f32 to vector<16x128xf32>
    %24 = arith.maximumf %22, %23 : vector<16x128xf32>
    %25 = arith.truncf %24 : vector<16x128xf32> to vector<16x128xbf16>
    %c0_18 = arith.constant 0 : index
    %c0_19 = arith.constant 0 : index
    %26 = vector.load %arg8[%c0_18, %c0_19] : memref<128x128xbf16, #tpu.memory_space<vmem>>, vector<128x128xbf16>
    %cst_20 = arith.constant dense<0.000000e+00> : vector<16x128xf32>
    %27 = tpu.matmul %25, %26, %cst_20 {dimension_numbers = #tpu.dot_dimension_numbers<[1], [0], [0], [1], [0, 0, 1, 1], [], []>} : vector<16x128xbf16>, vector<128x128xbf16>, vector<16x128xf32> -> vector<16x128xf32>
    %c0_21 = arith.constant 0 : index
    %c0_22 = arith.constant 0 : index
    %28 = vector.load %arg9[%c0_21, %c0_22] : memref<1x128xf32, #tpu.memory_space<vmem>>, vector<1x128xf32>
    %29 = vector.broadcast %28 : vector<1x128xf32> to vector<16x128xf32>
    %30 = arith.addf %27, %29 : vector<16x128xf32>
    %31 = arith.truncf %30 : vector<16x128xf32> to vector<16x128xbf16>
    %c0_23 = arith.constant 0 : index
    %c0_24 = arith.constant 0 : index
    %32 = vector.load %arg10[%c0_23, %c0_24] : memref<16x128xbf16, #tpu.memory_space<vmem>>, vector<16x128xbf16>
    tpu.vector_store %arg10[%c0_23, %c0_24], %31 {strides = array<i32>} : memref<16x128xbf16, #tpu.memory_space<vmem>>, vector<16x128xbf16>,
    return
  }
  func.func @transform_0(%arg0: i32) -> (i32, i32) {
    %c0_i32 = arith.constant 0 : i32
    %c0_i32_0 = arith.constant 0 : i32
    return %arg0, %c0_i32 : i32, i32
  }
  func.func @transform_1(%arg0: i32) -> (i32, i32) {
    %c0_i32 = arith.constant 0 : i32
    %c0_i32_0 = arith.constant 0 : i32
    %c0_i32_1 = arith.constant 0 : i32
    return %c0_i32, %c0_i32_0 : i32, i32
  }
  func.func @transform_2(%arg0: i32) -> (i32, i32) {
    %c0_i32 = arith.constant 0 : i32
    %c0_i32_0 = arith.constant 0 : i32
    %c0_i32_1 = arith.constant 0 : i32
    return %c0_i32, %c0_i32_0 : i32, i32
  }
  func.func @transform_3(%arg0: i32) -> (i32, i32) {
    %c0_i32 = arith.constant 0 : i32
    %c0_i32_0 = arith.constant 0 : i32
    %c0_i32_1 = arith.constant 0 : i32
    return %c0_i32, %c0_i32_0 : i32, i32
  }
  func.func @transform_4(%arg0: i32) -> (i32, i32) {
    %c0_i32 = arith.constant 0 : i32
    %c0_i32_0 = arith.constant 0 : i32
    %c0_i32_1 = arith.constant 0 : i32
    return %c0_i32, %c0_i32_0 : i32, i32
  }
  func.func @transform_5(%arg0: i32) -> (i32, i32) {
    %c0_i32 = arith.constant 0 : i32
    %c0_i32_0 = arith.constant 0 : i32
    %c0_i32_1 = arith.constant 0 : i32
    return %c0_i32, %c0_i32_0 : i32, i32
  }
  func.func @transform_6(%arg0: i32) -> (i32, i32) {
    %c0_i32 = arith.constant 0 : i32
    %c0_i32_0 = arith.constant 0 : i32
    %c0_i32_1 = arith.constant 0 : i32
    return %c0_i32, %c0_i32_0 : i32, i32
  }
  func.func @transform_7(%arg0: i32) -> (i32, i32) {
    %c0_i32 = arith.constant 0 : i32
    %c0_i32_0 = arith.constant 0 : i32
    %c0_i32_1 = arith.constant 0 : i32
    return %c0_i32, %c0_i32_0 : i32, i32
  }
  func.func @transform_8(%arg0: i32) -> (i32, i32) {
    %c0_i32 = arith.constant 0 : i32
    %c0_i32_0 = arith.constant 0 : i32
    %c0_i32_1 = arith.constant 0 : i32
    return %c0_i32, %c0_i32_0 : i32, i32
  }
  func.func @transform_9(%arg0: i32) -> (i32, i32) {
    %c0_i32 = arith.constant 0 : i32
    %c0_i32_0 = arith.constant 0 : i32
    return %arg0, %c0_i32 : i32, i32
  }
}

</mosaic_0001>

<bundles_post_ra>
// kernel: tpu_custom_call.1
= control target key start
LH: loop header
LB: loop body
LE: loop exit
PB: predicated region body
PF: predicated region fallthrough
CT: control target
= control target key end

     0   :  { %14 = vsyncpa [#allocation3], 0  ;;  %s4969_s0 = inlined_call_operand.hbm [shape: f32[16,3072], index: 0, kind: input, shape index: {}]   ;;  %s4970_s1 = inlined_call_operand.hbm [shape: bf16[3072,256], index: 1, kind: input, shape index: {}]   ;;  %s4971_s2 = inlined_call_operand.hbm [shape: f32[1,256], index: 2, kind: input, shape index: {}]   ;;  %s4972_s3 = inlined_call_operand.hbm [shape: bf16[256,128], index: 3, kind: input, shape index: {}]   ;;  %s4973_s4 = inlined_call_operand.hbm [shape: f32[1,128], index: 4, kind: input, shape index: {}]   ;;  %s4974_s5 = inlined_call_operand.hbm [shape: bf16[128,128], index: 5, kind: input, shape index: {}]   ;;  %s4975_s6 = inlined_call_operand.hbm [shape: f32[1,128], index: 6, kind: input, shape index: {}]   ;;  %s4976_s7 = inlined_call_operand.hbm [shape: bf16[128,128], index: 7, kind: input, shape index: {}]   ;;  %s4977_s8 = inlined_call_operand.hbm [shape: f32[1,128], index: 8, kind: input, shape index: {}]   ;;  %s4978_s9 = inlined_call_operand.hbm [shape: bf16[16,128], index: 9, kind: output, shape index: {}]  }
   0x1   :  { %15 = vsyncpa [#allocation6], 0 }
   0x2   :  { %16 = vsyncpa [#allocation9], 0 }
   0x3   :  { %17 = vsyncpa [#allocation12], 0 }
   0x4   :  { %18 = vsyncpa [#allocation15], 0 }
   0x5   :  { %19 = vsyncpa [#allocation4], 0  ;;  %s4841_s30 = smov [#allocation5]  }
   0x6   :  { %s37_s10 = sshll.u32 %s4841_s30, 4  ;;  %s38_s10 = int_to_ptr.vmem [resolvable:$true] %s37_s10 }
   0x7   :  { %s4637_s11 = scalar_lea.vmem %s38_s10, 49152  ;;  %p4642_p1 = scmp.lt.s32.totalorder %s38_s10, %s38_s10 }
   0x8   :  { %p4638_p0 = scmp.ne.s32.totalorder %s38_s10, %s4637_s11  ;;  %p4643_p2 = scmp.lt.s32.totalorder %s4637_s11, %s4637_s11 }
   0xa   :  { %p4644_p3 = por %p4643_p2, %p4642_p1 }
   0xc   :  { %p4645_p4 = pnand %p4644_p3, %p4638_p0 }
   0xe   :  { %4648 = shalt.err (!%p4645_p4)
}
   0xf   :  { %s4842_s12 = smov 128   ;;  %s4843_s13 = smov 8  }
  0x10   :  { %43 = dma.hbm_to_vmem [thread:$0]  %s4970_s1, 49152, %s38_s10, [#allocation6], %s4842_s12, %s4842_s12, %s4843_s13  }
  0x11   :  { %s4844_s16 = smov [#allocation8]  }
  0x12   :  { %s59_s17 = sshll.u32 %s4844_s16, 4  ;;  %s60_s17 = int_to_ptr.vmem [resolvable:$true] %s59_s17 }
  0x13   :  { %s4657_s18 = scalar_lea.vmem %s60_s17, 2048  ;;  %p4662_p6 = scmp.lt.s32.totalorder %s60_s17, %s60_s17 }
  0x14   :  { %p4658_p5 = scmp.ne.s32.totalorder %s60_s17, %s4657_s18  ;;  %p4663_p7 = scmp.lt.s32.totalorder %s4657_s18, %s4657_s18 }
  0x16   :  { %p4664_p8 = por %p4663_p7, %p4662_p6 }
  0x18   :  { %p4665_p9 = pnand %p4664_p8, %p4658_p5 }
  0x1a   :  { %4668 = shalt.err (!%p4665_p9)
}
  0x1b   :  { %s4845_s19 = smov 64   ;;  %s4846_s20 = smov 4  }
  0x1c   :  { %65 = dma.hbm_to_vmem [thread:$0]  %s4972_s3, 2048, %s60_s17, [#allocation9], %s4845_s19, %s4845_s19, %s4846_s20  }
  0x1d   :  { %s4847_s1 = smov [#allocation11]   ;;  %s4848_s24 = smov [#allocation14]  }
  0x1e   :  { %s81_s23 = sshll.u32 %s4847_s1, 4  ;;  %s103_s25 = sshll.u32 %s4848_s24, 4  ;;  %s82_s23 = int_to_ptr.vmem [resolvable:$true] %s81_s23  ;;  %s104_s25 = int_to_ptr.vmem [resolvable:$true] %s103_s25 }
  0x1f   :  { %s4677_s26 = scalar_lea.vmem %s82_s23, 1024  ;;  %p4682_p11 = scmp.lt.s32.totalorder %s82_s23, %s82_s23 }
  0x20   :  { %p4678_p10 = scmp.ne.s32.totalorder %s82_s23, %s4677_s26  ;;  %p4683_p12 = scmp.lt.s32.totalorder %s4677_s26, %s4677_s26 }
  0x22   :  { %p4684_p13 = por %p4683_p12, %p4682_p11 }
  0x24   :  { %p4685_p0 = pnand %p4684_p13, %p4678_p10 }
  0x26   :  { %4688 = shalt.err (!%p4685_p0)
}
  0x27   :  { %87 = dma.hbm_to_vmem [thread:$0]  %s4974_s5, 1024, %s82_s23, [#allocation12], %s4845_s19, %s4845_s19, %s4846_s20  }
  0x28   :  { %s4697_s3 = scalar_lea.vmem %s104_s25, 1024  ;;  %p4702_p2 = scmp.lt.s32.totalorder %s104_s25, %s104_s25 }
  0x29   :  { %p4698_p1 = scmp.ne.s32.totalorder %s104_s25, %s4697_s3  ;;  %p4703_p3 = scmp.lt.s32.totalorder %s4697_s3, %s4697_s3 }
  0x2b   :  { %p4704_p4 = por %p4703_p3, %p4702_p2 }
  0x2d   :  { %p4705_p5 = pnand %p4704_p4, %p4698_p1 }
  0x2f   :  { %4708 = shalt.err (!%p4705_p5)
}
  0x30   :  { %109 = dma.hbm_to_vmem [thread:$0]  %s4976_s7, 1024, %s104_s25, [#allocation15], %s4845_s19, %s4845_s19, %s4846_s20  }
  0x31   :  { %s4849_s10 = smov [#allocation2]  }
  0x32   :  { %s25_s11 = sshll.u32 %s4849_s10, 4  ;;  %s26_s11 = int_to_ptr.vmem [resolvable:$true] %s25_s11 }
  0x33   :  { %s4717_s12 = scalar_lea.vmem %s26_s11, 6144  ;;  %p4722_p7 = scmp.lt.s32.totalorder %s26_s11, %s26_s11 }
  0x34   :  { %p4718_p6 = scmp.ne.s32.totalorder %s26_s11, %s4717_s12  ;;  %p4723_p8 = scmp.lt.s32.totalorder %s4717_s12, %s4717_s12 }
  0x36   :  { %p4724_p9 = por %p4723_p8, %p4722_p7 }
  0x38   :  { %p4725_p10 = pnand %p4724_p9, %p4718_p6 }
  0x3a   :  { %4728 = shalt.err (!%p4725_p10)
}
  0x3b   :  { %s4850_s5 = smov 3072   ;;  %s4851_s13 = smov 192  }
  0x3c   :  { %31 = dma.hbm_to_vmem [thread:$0]  %s4969_s0, 6144, %s26_s11, [#allocation3], %s4850_s5, %s4850_s5, %s4851_s13  }
  0x3d   :  { %s4852_s16 = smov [#allocation7]   ;;  %s4853_s7 = smov [#allocation10]  }
  0x3e   :  { %s50_s17 = sshll.u32 %s4852_s16, 4  ;;  %s72_s18 = sshll.u32 %s4853_s7, 4  ;;  %s51_s17 = int_to_ptr.vmem [resolvable:$true] %s50_s17  ;;  %s73_s18 = int_to_ptr.vmem [resolvable:$true] %s72_s18 }
  0x3f   :  { %s4737_s21 = scalar_lea.vmem %s51_s17, 32  ;;  %p4742_p12 = scmp.lt.s32.totalorder %s51_s17, %s51_s17 }
  0x40   :  { %p4738_p11 = scmp.ne.s32.totalorder %s51_s17, %s4737_s21  ;;  %p4743_p13 = scmp.lt.s32.totalorder %s4737_s21, %s4737_s21 }
  0x42   :  { %p4744_p0 = por %p4743_p13, %p4742_p12 }
  0x44   :  { %p4745_p1 = pnand %p4744_p0, %p4738_p11 }
  0x46   :  { %4748 = shalt.err (!%p4745_p1)
}
  0x47   :  { %53 = dma.hbm_to_vmem [thread:$0]  %s4971_s2, 32, %s51_s17, [#allocation6]  }
  0x48   :  { %s4757_s23 = scalar_lea.vmem %s73_s18, 16  ;;  %s4761_s0 = scalar_lea.vmem %s73_s18, 32 }
  0x49   :  { %p4758_p2 = scmp.ne.s32.totalorder %s73_s18, %s4757_s23  ;;  %p4762_p3 = scmp.lt.s32.totalorder %s73_s18, %s73_s18 }
  0x4a   :  { %p4763_p4 = scmp.lt.s32.totalorder %s4761_s0, %s4757_s23 }
  0x4c   :  { %p4764_p5 = por %p4763_p4, %p4762_p3 }
  0x4e   :  { %p4765_p6 = pnand %p4764_p5, %p4758_p2 }
  0x50   :  { %4768 = shalt.err (!%p4765_p6)
}
  0x51   :  { %75 = dma.hbm_to_vmem [thread:$0]  %s4973_s4, 16, %s73_s18, [#allocation9]  }
  0x52   :  { %s4854_s26 = smov [#allocation13]   ;;  %s4855_s28 = smov [#allocation16]  }
  0x53   :  { %s94_s27 = sshll.u32 %s4854_s26, 4  ;;  %s116_s3 = sshll.u32 %s4855_s28, 4  ;;  %s95_s27 = int_to_ptr.vmem [resolvable:$true] %s94_s27  ;;  %s117_s3 = int_to_ptr.vmem [resolvable:$true] %s116_s3 }
  0x54   :  { %s4777_s29 = scalar_lea.vmem %s95_s27, 16  ;;  %s4781_s2 = scalar_lea.vmem %s95_s27, 32 }
  0x55   :  { %p4778_p7 = scmp.ne.s32.totalorder %s95_s27, %s4777_s29  ;;  %p4782_p8 = scmp.lt.s32.totalorder %s95_s27, %s95_s27 }
  0x56   :  { %p4783_p9 = scmp.lt.s32.totalorder %s4781_s2, %s4777_s29 }
  0x58   :  { %p4784_p10 = por %p4783_p9, %p4782_p8 }
  0x5a   :  { %p4785_p11 = pnand %p4784_p10, %p4778_p7 }
  0x5c   :  { %4788 = shalt.err (!%p4785_p11)
}
  0x5d   :  { %97 = dma.hbm_to_vmem [thread:$0]  %s4975_s6, 16, %s95_s27, [#allocation12]  }
  0x5e   :  { %s4797_s11 = scalar_lea.vmem %s117_s3, 16  ;;  %s4801_s4 = scalar_lea.vmem %s117_s3, 32 }
  0x5f   :  { %p4798_p12 = scmp.ne.s32.totalorder %s117_s3, %s4797_s11  ;;  %p4802_p13 = scmp.lt.s32.totalorder %s117_s3, %s117_s3 }
  0x60   :  { %p4803_p0 = scmp.lt.s32.totalorder %s4801_s4, %s4797_s11 }
  0x62   :  { %p4804_p1 = por %p4803_p0, %p4802_p13 }
  0x64   :  { %p4805_p2 = pnand %p4804_p1, %p4798_p12 }
  0x66   :  { %4808 = shalt.err (!%p4805_p2)
}
  0x67   :  { %119 = dma.hbm_to_vmem [thread:$0]  %s4977_s8, 16, %s117_s3, [#allocation15]  }
  0x68   :  { %4829 = dma.done.wait [#allocation3], 6144  }
  0x69   :  { %4830 = vsyncadd [#allocation3], 4294961152 }
  0x6a   :  { %4831 = dma.done.wait [#allocation6], 49184  }
  0x6b   :  { %4832 = vsyncadd [#allocation6], 4294918112 }
  0x6c   :  { %4833 = dma.done.wait [#allocation9], 2064  }
  0x6d   :  { %4834 = vsyncadd [#allocation9], 4294965232 }
  0x6e   :  { %4835 = dma.done.wait [#allocation12], 1040  }
  0x6f   :  { %4836 = vsyncadd [#allocation12], 4294966256 }
  0x70   :  { %4837 = dma.done.wait [#allocation15], 1040  }
  0x71   :  { %4838 = vsyncadd [#allocation15], 4294966256  ;;  %v4021_v0 = vld [vmem:[#allocation5 + $0x74] ss:$8 sps:$4 sm:$0xff]   ;;  %v4025_v2 = vld [vmem:[#allocation5 + $0x70] ss:$8 sps:$4 sm:$0xff]  }
  0x72   :  { %v4023_v1 = vld [vmem:[#allocation5 + $0x174] ss:$8 sps:$4 sm:$0xff]   ;;  %2536 = vmatprep.subr.bf16.mxu0 %v4021_v0  ;;  %v4026_v3 = vld [vmem:[#allocation5 + $0x170] ss:$8 sps:$4 sm:$0xff]   ;;  %v4027_v4 = vld [vmem:[#allocation5 + $0x64] ss:$8 sps:$4 sm:$0xff]  }
  0x73   :  { %2579 = vmatprep.subr.bf16.mxu1 %v4023_v1  ;;  %2537 = vmatpush1.bf16.msra.mxu0 %v4025_v2  ;;  %v4029_v5 = vld [vmem:[#allocation5 + $0x164] ss:$8 sps:$4 sm:$0xff]   ;;  %v4031_v6 = vld [vmem:[#allocation5 + $0x60] ss:$8 sps:$4 sm:$0xff]   ;;  %v4033_v8 = vld [vmem:[#allocation5 + $0x54] ss:$8 sps:$4 sm:$0xff]  }
  0x74   :  { %2580 = vmatpush1.bf16.msra.mxu1 %v4026_v3  ;;  %2538 = vmatprep.subr.bf16.mxu0 %v4027_v4  ;;  %v4032_v7 = vld [vmem:[#allocation5 + $0x160] ss:$8 sps:$4 sm:$0xff]   ;;  %v4035_v9 = vld [vmem:[#allocation5 + $0x154] ss:$8 sps:$4 sm:$0xff]   ;;  %v4037_v10 = vld [vmem:[#allocation5 + $0x50] ss:$8 sps:$4 sm:$0xff]  }
  0x75   :  { %2581 = vmatprep.subr.bf16.mxu1 %v4029_v5  ;;  %v4038_v11 = vld [vmem:[#allocation5 + $0x150] ss:$8 sps:$4 sm:$0xff]   ;;  %v4039_v12 = vld [vmem:[#allocation5 + $0x44] ss:$8 sps:$4 sm:$0xff]   ;;  %v4043_v14 = vld [vmem:[#allocation5 + $0x40] ss:$8 sps:$4 sm:$0xff]  }
  0x76   :  { %v4041_v13 = vld [vmem:[#allocation5 + $0x144] ss:$8 sps:$4 sm:$0xff]   ;;  %v4044_v15 = vld [vmem:[#allocation5 + $0x140] ss:$8 sps:$4 sm:$0xff]   ;;  %v4045_v16 = vld [vmem:[#allocation5 + $0x34] ss:$8 sps:$4 sm:$0xff]  }
  0x77   :  { %2539 = vmatpush1.bf16.msra.mxu0 %v4031_v6  ;;  %v4047_v17 = vld [vmem:[#allocation5 + $0x134] ss:$8 sps:$4 sm:$0xff]   ;;  %v4049_v18 = vld [vmem:[#allocation5 + $0x30] ss:$8 sps:$4 sm:$0xff]   ;;  %v4051_v20 = vld [vmem:[#allocation5 + $0x24] ss:$8 sps:$4 sm:$0xff]  }
  0x78   :  { %2582 = vmatpush1.bf16.msra.mxu1 %v4032_v7  ;;  %2540 = vmatprep.subr.bf16.mxu0 %v4033_v8  ;;  %v4050_v19 = vld [vmem:[#allocation5 + $0x130] ss:$8 sps:$4 sm:$0xff]   ;;  %v4053_v21 = vld [vmem:[#allocation5 + $0x124] ss:$8 sps:$4 sm:$0xff]   ;;  %v4055_v22 = vld [vmem:[#allocation5 + $0x20] ss:$8 sps:$4 sm:$0xff]  }
  0x79   :  { %2583 = vmatprep.subr.bf16.mxu1 %v4035_v9  ;;  %v4056_v23 = vld [vmem:[#allocation5 + $0x120] ss:$8 sps:$4 sm:$0xff]   ;;  %v4057_v24 = vld [vmem:[#allocation5 + $0x14] ss:$8 sps:$4 sm:$0xff]   ;;  %v4061_v26 = vld [vmem:[#allocation5 + $0x10] ss:$8 sps:$4 sm:$0xff]  }
  0x7a   :  { %v4059_v25 = vld [vmem:[#allocation5 + $0x114] ss:$8 sps:$4 sm:$0xff]   ;;  %v4062_v27 = vld [vmem:[#allocation5 + $0x110] ss:$8 sps:$4 sm:$0xff]   ;;  %v4063_v28 = vld [vmem:[#allocation5 + $0x4] ss:$8 sps:$4 sm:$0xff]  }
  0x7b   :  { %2541 = vmatpush1.bf16.msra.mxu0 %v4037_v10  ;;  %v4065_v29 = vld [vmem:[#allocation5 + $0x104] ss:$8 sps:$4 sm:$0xff]   ;;  %v4067_v30 = vld [vmem:[#allocation5] ss:$8 sps:$4 sm:$0xff]   ;;  %v4069_v32 = vld [vmem:[#allocation5 + $0xf4] ss:$8 sps:$4 sm:$0xff]  }
  0x7c   :  { %2584 = vmatpush1.bf16.msra.mxu1 %v4038_v11  ;;  %2542 = vmatprep.subr.bf16.mxu0 %v4039_v12  ;;  %v4068_v31 = vld [vmem:[#allocation5 + $0x100] ss:$8 sps:$4 sm:$0xff]   ;;  %v4071_v33 = vld [vmem:[#allocation5 + $0x1f4] ss:$8 sps:$4 sm:$0xff]   ;;  %v4073_v34 = vld [vmem:[#allocation5 + $0xf0] ss:$8 sps:$4 sm:$0xff]  }
  0x7d   :  { %2585 = vmatprep.subr.bf16.mxu1 %v4041_v13  ;;  %v4074_v35 = vld [vmem:[#allocation5 + $0x1f0] ss:$8 sps:$4 sm:$0xff]   ;;  %v4075_v36 = vld [vmem:[#allocation5 + $0xe4] ss:$8 sps:$4 sm:$0xff]   ;;  %v4079_v38 = vld [vmem:[#allocation5 + $0xe0] ss:$8 sps:$4 sm:$0xff]  }
  0x7e   :  { %v4077_v37 = vld [vmem:[#allocation5 + $0x1e4] ss:$8 sps:$4 sm:$0xff]   ;;  %v4080_v39 = vld [vmem:[#allocation5 + $0x1e0] ss:$8 sps:$4 sm:$0xff]   ;;  %v4081_v40 = vld [vmem:[#allocation5 + $0xd4] ss:$8 sps:$4 sm:$0xff]  }
  0x7f   :  { %2543 = vmatpush1.bf16.msra.mxu0 %v4043_v14  ;;  %v4083_v41 = vld [vmem:[#allocation5 + $0x1d4] ss:$8 sps:$4 sm:$0xff]   ;;  %v4085_v42 = vld [vmem:[#allocation5 + $0xd0] ss:$8 sps:$4 sm:$0xff]   ;;  %v4087_v44 = vld [vmem:[#allocation5 + $0xc4] ss:$8 sps:$4 sm:$0xff]  }
  0x80   :  { %2586 = vmatpush1.bf16.msra.mxu1 %v4044_v15  ;;  %2544 = vmatprep.subr.bf16.mxu0 %v4045_v16  ;;  %v4086_v43 = vld [vmem:[#allocation5 + $0x1d0] ss:$8 sps:$4 sm:$0xff]   ;;  %v4089_v45 = vld [vmem:[#allocation5 + $0x1c4] ss:$8 sps:$4 sm:$0xff]   ;;  %v4091_v50 = vld [vmem:[#allocation5 + $0xc0] ss:$8 sps:$4 sm:$0xff]  }
  0x81   :  { %2587 = vmatprep.subr.bf16.mxu1 %v4047_v17  ;;  %v149_v46 = vld [vmem:[#allocation2 + $0x8] sm:$0xff]  ;;  %v151_v48 = vld [vmem:[#allocation2 + $0x18] sm:$0xff]  ;;  %v148_v6 = vld [vmem:[#allocation2] sm:$0xff]  ;;  %vm4857_vm0 = vmmov 0   ;;  %s4858_s6 = smov [#allocation17]  }
  0x82   :  { %v173_v47 = vld [vmem:[#allocation2 + $0xc8] sm:$0xff]  ;;  %v175_v49 = vld [vmem:[#allocation2 + $0xd8] sm:$0xff]  ;;  %v172_v7 = vld [vmem:[#allocation2 + $0xc0] sm:$0xff]  ;;  %s3479_s8 = sshll.u32 %s4858_s6, 4  ;;  %s3480_s8 = int_to_ptr.vmem [resolvable:$true] %s3479_s8 }
  0x83   :  { %2545 = vmatpush1.bf16.msra.mxu0 %v4049_v18  ;;  %v4092_v51 = vld [vmem:[#allocation5 + $0x1c0] ss:$8 sps:$4 sm:$0xff]   ;;  %v4093_v52 = vld [vmem:[#allocation5 + $0xb4] ss:$8 sps:$4 sm:$0xff]   ;;  %v197_v53 = vpack.c.bf16 %v173_v47, %v149_v46  ;;  %v199_v54 = vpack.c.bf16 %v175_v49, %v151_v48  ;;  %v4097_v56 = vld [vmem:[#allocation5 + $0xb0] ss:$8 sps:$4 sm:$0xff]   ;;  %v196_v12 = vpack.c.bf16 %v172_v7, %v148_v6  ;;  %p4814_p4 = scmp.lt.s32.totalorder %s3480_s8, %s3480_s8 }
  0x84   :  { %2588 = vmatpush1.bf16.msra.mxu1 %v4050_v19  ;;  %2546 = vmatprep.subr.bf16.mxu0 %v4051_v20  ;;  %v4095_v55 = vld [vmem:[#allocation5 + $0x1b4] ss:$8 sps:$4 sm:$0xff]   ;;  %v4098_v57 = vld [vmem:[#allocation5 + $0x1b0] ss:$8 sps:$4 sm:$0xff]   ;;  %v4099_v58 = vld [vmem:[#allocation5 + $0xa4] ss:$8 sps:$4 sm:$0xff]  }
  0x85   :  { %2589 = vmatprep.subr.bf16.mxu1 %v4053_v21  ;;  %2568 = vmatprep.mubr.bf16.mxu0 %v197_v53  ;;  %v4101_v59 = vld [vmem:[#allocation5 + $0x1a4] ss:$8 sps:$4 sm:$0xff]   ;;  %v4103_v60 = vld [vmem:[#allocation5 + $0xa0] ss:$8 sps:$4 sm:$0xff]   ;;  %v4105_v62 = vld [vmem:[#allocation5 + $0x94] ss:$8 sps:$4 sm:$0xff]  }
  0x86   :  { %2611 = vmatprep.mubr.bf16.mxu1 %v199_v54  ;;  %v4104_v61 = vld [vmem:[#allocation5 + $0x1a0] ss:$8 sps:$4 sm:$0xff]   ;;  %v4107_v63 = vld [vmem:[#allocation5 + $0x194] ss:$8 sps:$4 sm:$0xff]   ;;  %v4109_v0 = vld [vmem:[#allocation5 + $0x90] ss:$8 sps:$4 sm:$0xff]  }
  0x87   :  { %2547 = vmatpush1.bf16.msra.mxu0 %v4055_v22  ;;  %v4110_v1 = vld [vmem:[#allocation5 + $0x190] ss:$8 sps:$4 sm:$0xff]   ;;  %v4111_v2 = vld [vmem:[#allocation5 + $0x84] ss:$8 sps:$4 sm:$0xff]   ;;  %v4115_v4 = vld [vmem:[#allocation5 + $0x80] ss:$8 sps:$4 sm:$0xff]  }
  0x88   :  { %2590 = vmatpush1.bf16.msra.mxu1 %v4056_v23  ;;  %2548 = vmatprep.subr.bf16.mxu0 %v4057_v24  ;;  %v4113_v3 = vld [vmem:[#allocation5 + $0x184] ss:$8 sps:$4 sm:$0xff]   ;;  %v4116_v5 = vld [vmem:[#allocation5 + $0x180] ss:$8 sps:$4 sm:$0xff]   ;;  %v150_v8 = vld [vmem:[#allocation2 + $0x10] sm:$0xff]  ;;  %s4809_s13 = scalar_lea.vmem %s3480_s8, 128 }
  0x89   :  { %2591 = vmatprep.subr.bf16.mxu1 %v4059_v25  ;;  %v174_v9 = vld [vmem:[#allocation2 + $0xd0] sm:$0xff]  ;;  %v4125_v16 = vld [vmem:[#allocation5 + $0x264] ss:$8 sps:$4 sm:$0xff]   ;;  %v4123_v18 = vld [vmem:[#allocation5 + $0x260] ss:$8 sps:$4 sm:$0xff]   ;;  %p4810_p3 = scmp.ne.s32.totalorder %s3480_s8, %s4809_s13  ;;  %p4815_p5 = scmp.lt.s32.totalorder %s4809_s13, %s4809_s13 }
  0x8a   :  { %v4119_v10 = vld [vmem:[#allocation5 + $0x274] ss:$8 sps:$4 sm:$0xff]   ;;  %v198_v13 = vpack.c.bf16 %v174_v9, %v150_v8  ;;  %v4117_v14 = vld [vmem:[#allocation5 + $0x270] ss:$8 sps:$4 sm:$0xff]   ;;  %v4128_v17 = vld [vmem:[#allocation5 + $0x364] ss:$8 sps:$4 sm:$0xff]  }
  0x8b   :  { %2549 = vmatpush1.bf16.msra.mxu0 %v4061_v26  ;;  %v4122_v11 = vld [vmem:[#allocation5 + $0x374] ss:$8 sps:$4 sm:$0xff]   ;;  %v4120_v15 = vld [vmem:[#allocation5 + $0x370] ss:$8 sps:$4 sm:$0xff]   ;;  %v4126_v19 = vld [vmem:[#allocation5 + $0x360] ss:$8 sps:$4 sm:$0xff]   ;;  %p4816_p6 = por %p4815_p5, %p4814_p4 }
  0x8c   :  { %2592 = vmatpush1.bf16.msra.mxu1 %v4062_v27  ;;  %2550 = vmatprep.subr.bf16.mxu0 %v4063_v28  ;;  %v4131_v20 = vld [vmem:[#allocation5 + $0x254] ss:$8 sps:$4 sm:$0xff]   ;;  %v4129_v22 = vld [vmem:[#allocation5 + $0x250] ss:$8 sps:$4 sm:$0xff]   ;;  %v4137_v24 = vld [vmem:[#allocation5 + $0x244] ss:$8 sps:$4 sm:$0xff]  }
  0x8d   :  { %2593 = vmatprep.subr.bf16.mxu1 %v4065_v29  ;;  %v4134_v21 = vld [vmem:[#allocation5 + $0x354] ss:$8 sps:$4 sm:$0xff]   ;;  %v4132_v23 = vld [vmem:[#allocation5 + $0x350] ss:$8 sps:$4 sm:$0xff]   ;;  %v4140_v25 = vld [vmem:[#allocation5 + $0x344] ss:$8 sps:$4 sm:$0xff]   ;;  %p4817_p7 = pnand %p4816_p6, %p4810_p3 }
  0x8e   :  { %v4135_v26 = vld [vmem:[#allocation5 + $0x240] ss:$8 sps:$4 sm:$0xff]   ;;  %v4143_v28 = vld [vmem:[#allocation5 + $0x234] ss:$8 sps:$4 sm:$0xff]   ;;  %v4168_v53 = vld [vmem:[#allocation5 + $0x3f0] ss:$8 sps:$4 sm:$0xff]  }
  0x8f   :  { %2551 = vmatpush1.bf16.msra.mxu0 %v4067_v30  ;;  %v4138_v27 = vld [vmem:[#allocation5 + $0x340] ss:$8 sps:$4 sm:$0xff]   ;;  %v4146_v29 = vld [vmem:[#allocation5 + $0x334] ss:$8 sps:$4 sm:$0xff]   ;;  %v4141_v30 = vld [vmem:[#allocation5 + $0x230] ss:$8 sps:$4 sm:$0xff]  }
  0x90   :  { %2594 = vmatpush1.bf16.msra.mxu1 %v4068_v31  ;;  %2552 = vmatprep.subr.bf16.mxu0 %v4069_v32  ;;  %v4144_v31 = vld [vmem:[#allocation5 + $0x330] ss:$8 sps:$4 sm:$0xff]   ;;  %v4149_v32 = vld [vmem:[#allocation5 + $0x224] ss:$8 sps:$4 sm:$0xff]   ;;  %v4159_v48 = vld [vmem:[#allocation5 + $0x200] ss:$8 sps:$4 sm:$0xff]  }
  0x91   :  { %2595 = vmatprep.subr.bf16.mxu1 %v4071_v33  ;;  %v4152_v33 = vld [vmem:[#allocation5 + $0x324] ss:$8 sps:$4 sm:$0xff]   ;;  %v179_v46 = vld [vmem:[#allocation2 + $0xf8] sm:$0xff]  ;;  %v4162_v49 = vld [vmem:[#allocation5 + $0x300] ss:$8 sps:$4 sm:$0xff]  }
  0x92   :  { %v4173_v54 = vld [vmem:[#allocation5 + $0x2e4] ss:$8 sps:$4 sm:$0xff]   ;;  %v4195_v8 = vld [vmem:[#allocation5 + $0x2a0] ss:$8 sps:$4 sm:$0xff]  }
  0x93   :  { %2553 = vmatpush2.bf16.msra.mxu0 %v4073_v34  ;;  %v4147_v34 = vld [vmem:[#allocation5 + $0x220] ss:$8 sps:$4 sm:$0xff]   ;;  %v4197_v6 = vld [vmem:[#allocation5 + $0x2a4] ss:$8 sps:$4 sm:$0xff]  }
  0x94   :  { %2596 = vmatpush2.bf16.msra.mxu1 %v4074_v35  ;;  %2554 = vmatprep.subr.bf16.mxu0 %v4075_v36  ;;  %v4150_v35 = vld [vmem:[#allocation5 + $0x320] ss:$8 sps:$4 sm:$0xff]   ;;  %v4155_v36 = vld [vmem:[#allocation5 + $0x214] ss:$8 sps:$4 sm:$0xff]   ;;  %v4200_v7 = vld [vmem:[#allocation5 + $0x3a4] ss:$8 sps:$4 sm:$0xff]  }
  0x95   :  { %2597 = vmatprep.subr.bf16.mxu1 %v4077_v37  ;;  %v4158_v37 = vld [vmem:[#allocation5 + $0x314] ss:$8 sps:$4 sm:$0xff]   ;;  %v4198_v9 = vld [vmem:[#allocation5 + $0x3a0] ss:$8 sps:$4 sm:$0xff]  }
  0x97   :  { %2555 = vmatpush2.bf16.msra.mxu0 %v4079_v38  ;;  %v4153_v38 = vld [vmem:[#allocation5 + $0x210] ss:$8 sps:$4 sm:$0xff]  }
  0x98   :  { %2598 = vmatpush2.bf16.msra.mxu1 %v4080_v39  ;;  %2556 = vmatprep.subr.bf16.mxu0 %v4081_v40  ;;  %v4156_v39 = vld [vmem:[#allocation5 + $0x310] ss:$8 sps:$4 sm:$0xff]   ;;  %v153_v40 = vld [vmem:[#allocation2 + $0x28] sm:$0xff] }
  0x99   :  { %2599 = vmatprep.subr.bf16.mxu1 %v4083_v41  ;;  %v177_v41 = vld [vmem:[#allocation2 + $0xe8] sm:$0xff] }
  0x9b   :  { %2557 = vmatpush2.bf16.msra.mxu0 %v4085_v42  ;;  %v155_v42 = vld [vmem:[#allocation2 + $0x38] sm:$0xff] }
  0x9c   :  { %2600 = vmatpush2.bf16.msra.mxu1 %v4086_v43  ;;  %2558 = vmatprep.subr.bf16.mxu0 %v4087_v44  ;;  %v4161_v43 = vld [vmem:[#allocation5 + $0x204] ss:$8 sps:$4 sm:$0xff]   ;;  %v203_v47 = vpack.c.bf16 %v179_v46, %v155_v42  ;;  %v4239_v46 = vld [vmem:[#allocation5 + $0x434] ss:$8 sps:$4 sm:$0xff]  }
  0x9d   :  { %2601 = vmatprep.subr.bf16.mxu1 %v4089_v45  ;;  %v4164_v44 = vld [vmem:[#allocation5 + $0x304] ss:$8 sps:$4 sm:$0xff]   ;;  %v201_v45 = vpack.c.bf16 %v177_v41, %v153_v40  ;;  %v4228_v40 = vld [vmem:[#allocation5 + $0x550] ss:$8 sps:$4 sm:$0xff]  }
  0x9e   :  { %v4233_v42 = vld [vmem:[#allocation5 + $0x444] ss:$8 sps:$4 sm:$0xff]  }
  0x9f   :  { %2559 = vmatpush2.bf16.msra.mxu0 %v4091_v50  ;;  %v4167_v50 = vld [vmem:[#allocation5 + $0x2f4] ss:$8 sps:$4 sm:$0xff]  }
  0xa0   :  { %2602 = vmatpush2.bf16.msra.mxu1 %v4092_v51  ;;  %2560 = vmatprep.subr.bf16.mxu0 %v4093_v52  ;;  %v4170_v51 = vld [vmem:[#allocation5 + $0x3f4] ss:$8 sps:$4 sm:$0xff]   ;;  %v4165_v52 = vld [vmem:[#allocation5 + $0x2f0] ss:$8 sps:$4 sm:$0xff]  }
  0xa1   :  { %2603 = vmatprep.subr.bf16.mxu1 %v4095_v55  ;;  %v4176_v55 = vld [vmem:[#allocation5 + $0x3e4] ss:$8 sps:$4 sm:$0xff]  }
  0xa3   :  { %2561 = vmatpush2.bf16.msra.mxu0 %v4097_v56  ;;  %v4171_v56 = vld [vmem:[#allocation5 + $0x2e0] ss:$8 sps:$4 sm:$0xff]  }
  0xa4   :  { %2604 = vmatpush2.bf16.msra.mxu1 %v4098_v57  ;;  %2562 = vmatprep.subr.bf16.mxu0 %v4099_v58  ;;  %v4174_v57 = vld [vmem:[#allocation5 + $0x3e0] ss:$8 sps:$4 sm:$0xff]   ;;  %v4179_v58 = vld [vmem:[#allocation5 + $0x2d4] ss:$8 sps:$4 sm:$0xff]  }
  0xa5   :  { %2605 = vmatprep.subr.bf16.mxu1 %v4101_v59  ;;  %v4182_v59 = vld [vmem:[#allocation5 + $0x3d4] ss:$8 sps:$4 sm:$0xff]  }
  0xa7   :  { %2563 = vmatpush2.bf16.msra.mxu0 %v4103_v60  ;;  %v4177_v60 = vld [vmem:[#allocation5 + $0x2d0] ss:$8 sps:$4 sm:$0xff]  }
  0xa8   :  { %2606 = vmatpush2.bf16.msra.mxu1 %v4104_v61  ;;  %2564 = vmatprep.subr.bf16.mxu0 %v4105_v62  ;;  %v4180_v61 = vld [vmem:[#allocation5 + $0x3d0] ss:$8 sps:$4 sm:$0xff]   ;;  %v4185_v62 = vld [vmem:[#allocation5 + $0x2c4] ss:$8 sps:$4 sm:$0xff]  }
  0xa9   :  { %2607 = vmatprep.subr.bf16.mxu1 %v4107_v63  ;;  %v4188_v63 = vld [vmem:[#allocation5 + $0x3c4] ss:$8 sps:$4 sm:$0xff]  }
  0xab   :  { %2565 = vmatpush2.bf16.msra.mxu0 %v4109_v0  ;;  %v4183_v0 = vld [vmem:[#allocation5 + $0x2c0] ss:$8 sps:$4 sm:$0xff]  }
  0xac   :  { %2608 = vmatpush2.bf16.msra.mxu1 %v4110_v1  ;;  %2566 = vmatprep.subr.bf16.mxu0 %v4111_v2  ;;  %v4186_v1 = vld [vmem:[#allocation5 + $0x3c0] ss:$8 sps:$4 sm:$0xff]   ;;  %v4191_v2 = vld [vmem:[#allocation5 + $0x2b4] ss:$8 sps:$4 sm:$0xff]  }
  0xad   :  { %2609 = vmatprep.subr.bf16.mxu1 %v4113_v3  ;;  %v4194_v3 = vld [vmem:[#allocation5 + $0x3b4] ss:$8 sps:$4 sm:$0xff]  }
  0xaf   :  { %2567 = vmatpush2.bf16.msra.mxu0 %v4115_v4  ;;  %v4189_v4 = vld [vmem:[#allocation5 + $0x2b0] ss:$8 sps:$4 sm:$0xff]  }
  0xb0   :  { %2610 = vmatpush2.bf16.msra.mxu1 %v4116_v5  ;;  %2622 = vmatprep.subr.bf16.mxu0 %v4119_v10  ;;  %v4192_v5 = vld [vmem:[#allocation5 + $0x3b0] ss:$8 sps:$4 sm:$0xff]   ;;  %v4203_v10 = vld [vmem:[#allocation5 + $0x294] ss:$8 sps:$4 sm:$0xff]  }
  0xb1   :  { %2665 = vmatprep.subr.bf16.mxu1 %v4122_v11  ;;  %v4206_v11 = vld [vmem:[#allocation5 + $0x394] ss:$8 sps:$4 sm:$0xff]  }
  0xb2   :  { %2569 = vmatmul.mubr.bf16.vlgmr.msra.gmra.mxu0 %v196_v12  ;;  %v4201_v12 = vld [vmem:[#allocation5 + $0x290] ss:$8 sps:$4 sm:$0xff]  }
  0xb3   :  { %2612 = vmatmul.mubr.bf16.vlgmr.msra.gmra.mxu1 %v198_v13  ;;  %2623 = vmatpush1.bf16.msra.mxu0 %v4117_v14  ;;  %v4204_v13 = vld [vmem:[#allocation5 + $0x390] ss:$8 sps:$4 sm:$0xff]   ;;  %v4209_v14 = vld [vmem:[#allocation5 + $0x284] ss:$8 sps:$4 sm:$0xff]  }
  0xb4   :  { %2666 = vmatpush1.bf16.msra.mxu1 %v4120_v15  ;;  %2624 = vmatprep.subr.bf16.mxu0 %v4125_v16  ;;  %v4212_v15 = vld [vmem:[#allocation5 + $0x384] ss:$8 sps:$4 sm:$0xff]   ;;  %v4207_v16 = vld [vmem:[#allocation5 + $0x280] ss:$8 sps:$4 sm:$0xff]  }
  0xb5   :  { %2667 = vmatprep.subr.bf16.mxu1 %v4128_v17  ;;  %2654 = vmatprep.mubr.bf16.mxu0 %v201_v45  ;;  %v4210_v17 = vld [vmem:[#allocation5 + $0x380] ss:$8 sps:$4 sm:$0xff]  }
  0xb6   :  { %2697 = vmatprep.mubr.bf16.mxu1 %v203_v47  ;;  %v4234_v45 = vld [vmem:[#allocation5 + $0x540] ss:$8 sps:$4 sm:$0xff]   ;;  %v4242_v47 = vld [vmem:[#allocation5 + $0x534] ss:$8 sps:$4 sm:$0xff]  }
  0xb7   :  { %2625 = vmatpush1.bf16.msra.mxu0 %v4123_v18  ;;  %v152_v18 = vld [vmem:[#allocation2 + $0x20] sm:$0xff] }
  0xb8   :  { %2668 = vmatpush1.bf16.msra.mxu1 %v4126_v19  ;;  %2626 = vmatprep.subr.bf16.mxu0 %v4131_v20  ;;  %v176_v19 = vld [vmem:[#allocation2 + $0xe0] sm:$0xff]  ;;  %v154_v20 = vld [vmem:[#allocation2 + $0x30] sm:$0xff] }
  0xb9   :  { %2669 = vmatprep.subr.bf16.mxu1 %v4134_v21  ;;  %v178_v21 = vld [vmem:[#allocation2 + $0xf0] sm:$0xff] }
  0xbb   :  { %2627 = vmatpush1.bf16.msra.mxu0 %v4129_v22  ;;  %v4215_v22 = vld [vmem:[#allocation5 + $0x474] ss:$8 sps:$4 sm:$0xff]  }
  0xbc   :  { %2670 = vmatpush1.bf16.msra.mxu1 %v4132_v23  ;;  %2628 = vmatprep.subr.bf16.mxu0 %v4137_v24  ;;  %v4218_v23 = vld [vmem:[#allocation5 + $0x574] ss:$8 sps:$4 sm:$0xff]   ;;  %v200_v24 = vpack.c.bf16 %v176_v19, %v152_v18  ;;  %v4293_v18 = vld [vmem:[#allocation5 + $0x4a4] ss:$8 sps:$4 sm:$0xff]  }
  0xbd   :  { %2671 = vmatprep.subr.bf16.mxu1 %v4140_v25  ;;  %v202_v25 = vpack.c.bf16 %v178_v21, %v154_v20  ;;  %v4296_v19 = vld [vmem:[#allocation5 + $0x5a4] ss:$8 sps:$4 sm:$0xff]   ;;  %v4291_v20 = vld [vmem:[#allocation5 + $0x4a0] ss:$8 sps:$4 sm:$0xff]  }
  0xbe   :  { %v4294_v21 = vld [vmem:[#allocation5 + $0x5a0] ss:$8 sps:$4 sm:$0xff]  }
  0xbf   :  { %2629 = vmatpush1.bf16.msra.mxu0 %v4135_v26  ;;  %v4213_v26 = vld [vmem:[#allocation5 + $0x470] ss:$8 sps:$4 sm:$0xff]  }
  0xc0   :  { %2672 = vmatpush1.bf16.msra.mxu1 %v4138_v27  ;;  %2630 = vmatprep.subr.bf16.mxu0 %v4143_v28  ;;  %v4216_v27 = vld [vmem:[#allocation5 + $0x570] ss:$8 sps:$4 sm:$0xff]   ;;  %v4221_v28 = vld [vmem:[#allocation5 + $0x464] ss:$8 sps:$4 sm:$0xff]  }
  0xc1   :  { %2673 = vmatprep.subr.bf16.mxu1 %v4146_v29  ;;  %v4224_v29 = vld [vmem:[#allocation5 + $0x564] ss:$8 sps:$4 sm:$0xff]  }
  0xc3   :  { %2631 = vmatpush1.bf16.msra.mxu0 %v4141_v30  ;;  %v4219_v30 = vld [vmem:[#allocation5 + $0x460] ss:$8 sps:$4 sm:$0xff]  }
  0xc4   :  { %2674 = vmatpush1.bf16.msra.mxu1 %v4144_v31  ;;  %2632 = vmatprep.subr.bf16.mxu0 %v4149_v32  ;;  %v4222_v31 = vld [vmem:[#allocation5 + $0x560] ss:$8 sps:$4 sm:$0xff]   ;;  %v4227_v32 = vld [vmem:[#allocation5 + $0x454] ss:$8 sps:$4 sm:$0xff]  }
  0xc5   :  { %2675 = vmatprep.subr.bf16.mxu1 %v4152_v33  ;;  %v4230_v33 = vld [vmem:[#allocation5 + $0x554] ss:$8 sps:$4 sm:$0xff]  }
  0xc7   :  { %2633 = vmatpush1.bf16.msra.mxu0 %v4147_v34  ;;  %v157_v34 = vld [vmem:[#allocation2 + $0x48] sm:$0xff] }
  0xc8   :  { %2676 = vmatpush1.bf16.msra.mxu1 %v4150_v35  ;;  %2634 = vmatprep.subr.bf16.mxu0 %v4155_v36  ;;  %v181_v35 = vld [vmem:[#allocation2 + $0x108] sm:$0xff] }
  0xc9   :  { %2677 = vmatprep.subr.bf16.mxu1 %v4158_v37  ;;  %v205_v36 = vpack.c.bf16 %v181_v35, %v157_v34  ;;  %v159_v37 = vld [vmem:[#allocation2 + $0x58] sm:$0xff] }
  0xca   :  { %v4311_v34 = vld [vmem:[#allocation5 + $0x674] ss:$8 sps:$4 sm:$0xff]  }
  0xcb   :  { %2635 = vmatpush1.bf16.msra.mxu0 %v4153_v38  ;;  %v183_v38 = vld [vmem:[#allocation2 + $0x118] sm:$0xff] }
  0xcc   :  { %2678 = vmatpush1.bf16.msra.mxu1 %v4156_v39  ;;  %2636 = vmatprep.subr.bf16.mxu0 %v4161_v43  ;;  %v4225_v39 = vld [vmem:[#allocation5 + $0x450] ss:$8 sps:$4 sm:$0xff]   ;;  %v207_v41 = vpack.c.bf16 %v183_v38, %v159_v37  ;;  %v4236_v43 = vld [vmem:[#allocation5 + $0x544] ss:$8 sps:$4 sm:$0xff]   ;;  %v4314_v35 = vld [vmem:[#allocation5 + $0x774] ss:$8 sps:$4 sm:$0xff]  }
  0xcd   :  { %2679 = vmatprep.subr.bf16.mxu1 %v4164_v44  ;;  %v4231_v44 = vld [vmem:[#allocation5 + $0x440] ss:$8 sps:$4 sm:$0xff]   ;;  %v4309_v37 = vld [vmem:[#allocation5 + $0x670] ss:$8 sps:$4 sm:$0xff]  }
  0xce   :  { %v185_v38 = vld [vmem:[#allocation2 + $0x128] sm:$0xff] }
  0xcf   :  { %2637 = vmatpush1.bf16.msra.mxu0 %v4159_v48  ;;  %v4237_v48 = vld [vmem:[#allocation5 + $0x430] ss:$8 sps:$4 sm:$0xff]  }
  0xd0   :  { %2680 = vmatpush1.bf16.msra.mxu1 %v4162_v49  ;;  %2638 = vmatprep.subr.bf16.mxu0 %v4167_v50  ;;  %v4240_v49 = vld [vmem:[#allocation5 + $0x530] ss:$8 sps:$4 sm:$0xff]   ;;  %v4245_v50 = vld [vmem:[#allocation5 + $0x424] ss:$8 sps:$4 sm:$0xff]  }
  0xd1   :  { %2681 = vmatprep.subr.bf16.mxu1 %v4170_v51  ;;  %v4248_v51 = vld [vmem:[#allocation5 + $0x524] ss:$8 sps:$4 sm:$0xff]  }
  0xd3   :  { %2639 = vmatpush2.bf16.msra.mxu0 %v4165_v52  ;;  %v4243_v52 = vld [vmem:[#allocation5 + $0x420] ss:$8 sps:$4 sm:$0xff]  }
  0xd4   :  { %2682 = vmatpush2.bf16.msra.mxu1 %v4168_v53  ;;  %2640 = vmatprep.subr.bf16.mxu0 %v4173_v54  ;;  %v4246_v53 = vld [vmem:[#allocation5 + $0x520] ss:$8 sps:$4 sm:$0xff]   ;;  %v4251_v54 = vld [vmem:[#allocation5 + $0x414] ss:$8 sps:$4 sm:$0xff]  }
  0xd5   :  { %2683 = vmatprep.subr.bf16.mxu1 %v4176_v55  ;;  %v4254_v55 = vld [vmem:[#allocation5 + $0x514] ss:$8 sps:$4 sm:$0xff]  }
  0xd7   :  { %2641 = vmatpush2.bf16.msra.mxu0 %v4171_v56  ;;  %v4249_v56 = vld [vmem:[#allocation5 + $0x410] ss:$8 sps:$4 sm:$0xff]  }
  0xd8   :  { %2684 = vmatpush2.bf16.msra.mxu1 %v4174_v57  ;;  %2642 = vmatprep.subr.bf16.mxu0 %v4179_v58  ;;  %v4252_v57 = vld [vmem:[#allocation5 + $0x510] ss:$8 sps:$4 sm:$0xff]   ;;  %v4257_v58 = vld [vmem:[#allocation5 + $0x404] ss:$8 sps:$4 sm:$0xff]  }
  0xd9   :  { %2685 = vmatprep.subr.bf16.mxu1 %v4182_v59  ;;  %v4260_v59 = vld [vmem:[#allocation5 + $0x504] ss:$8 sps:$4 sm:$0xff]  }
  0xdb   :  { %2643 = vmatpush2.bf16.msra.mxu0 %v4177_v60  ;;  %v4255_v60 = vld [vmem:[#allocation5 + $0x400] ss:$8 sps:$4 sm:$0xff]  }
  0xdc   :  { %2686 = vmatpush2.bf16.msra.mxu1 %v4180_v61  ;;  %2644 = vmatprep.subr.bf16.mxu0 %v4185_v62  ;;  %v4258_v61 = vld [vmem:[#allocation5 + $0x500] ss:$8 sps:$4 sm:$0xff]   ;;  %v4263_v62 = vld [vmem:[#allocation5 + $0x4f4] ss:$8 sps:$4 sm:$0xff]  }
  0xdd   :  { %2687 = vmatprep.subr.bf16.mxu1 %v4188_v63  ;;  %v4266_v63 = vld [vmem:[#allocation5 + $0x5f4] ss:$8 sps:$4 sm:$0xff]  }
  0xdf   :  { %2645 = vmatpush2.bf16.msra.mxu0 %v4183_v0  ;;  %v4261_v0 = vld [vmem:[#allocation5 + $0x4f0] ss:$8 sps:$4 sm:$0xff]  }
  0xe0   :  { %2688 = vmatpush2.bf16.msra.mxu1 %v4186_v1  ;;  %2646 = vmatprep.subr.bf16.mxu0 %v4191_v2  ;;  %v4264_v1 = vld [vmem:[#allocation5 + $0x5f0] ss:$8 sps:$4 sm:$0xff]   ;;  %v4269_v2 = vld [vmem:[#allocation5 + $0x4e4] ss:$8 sps:$4 sm:$0xff]  }
  0xe1   :  { %2689 = vmatprep.subr.bf16.mxu1 %v4194_v3  ;;  %v4272_v3 = vld [vmem:[#allocation5 + $0x5e4] ss:$8 sps:$4 sm:$0xff]  }
  0xe3   :  { %2647 = vmatpush2.bf16.msra.mxu0 %v4189_v4  ;;  %v4267_v4 = vld [vmem:[#allocation5 + $0x4e0] ss:$8 sps:$4 sm:$0xff]  }
  0xe4   :  { %2690 = vmatpush2.bf16.msra.mxu1 %v4192_v5  ;;  %2648 = vmatprep.subr.bf16.mxu0 %v4197_v6  ;;  %v4270_v5 = vld [vmem:[#allocation5 + $0x5e0] ss:$8 sps:$4 sm:$0xff]   ;;  %v4275_v6 = vld [vmem:[#allocation5 + $0x4d4] ss:$8 sps:$4 sm:$0xff]  }
  0xe5   :  { %2691 = vmatprep.subr.bf16.mxu1 %v4200_v7  ;;  %v4278_v7 = vld [vmem:[#allocation5 + $0x5d4] ss:$8 sps:$4 sm:$0xff]  }
  0xe7   :  { %2649 = vmatpush2.bf16.msra.mxu0 %v4195_v8  ;;  %v4273_v8 = vld [vmem:[#allocation5 + $0x4d0] ss:$8 sps:$4 sm:$0xff]  }
  0xe8   :  { %2692 = vmatpush2.bf16.msra.mxu1 %v4198_v9  ;;  %2650 = vmatprep.subr.bf16.mxu0 %v4203_v10  ;;  %v4276_v9 = vld [vmem:[#allocation5 + $0x5d0] ss:$8 sps:$4 sm:$0xff]   ;;  %v4281_v10 = vld [vmem:[#allocation5 + $0x4c4] ss:$8 sps:$4 sm:$0xff]  }
  0xe9   :  { %2693 = vmatprep.subr.bf16.mxu1 %v4206_v11  ;;  %v4284_v11 = vld [vmem:[#allocation5 + $0x5c4] ss:$8 sps:$4 sm:$0xff]  }
  0xeb   :  { %2651 = vmatpush2.bf16.msra.mxu0 %v4201_v12  ;;  %v4279_v12 = vld [vmem:[#allocation5 + $0x4c0] ss:$8 sps:$4 sm:$0xff]  }
  0xec   :  { %2694 = vmatpush2.bf16.msra.mxu1 %v4204_v13  ;;  %2652 = vmatprep.subr.bf16.mxu0 %v4209_v14  ;;  %v4282_v13 = vld [vmem:[#allocation5 + $0x5c0] ss:$8 sps:$4 sm:$0xff]   ;;  %v4287_v14 = vld [vmem:[#allocation5 + $0x4b4] ss:$8 sps:$4 sm:$0xff]  }
  0xed   :  { %2695 = vmatprep.subr.bf16.mxu1 %v4212_v15  ;;  %v4290_v15 = vld [vmem:[#allocation5 + $0x5b4] ss:$8 sps:$4 sm:$0xff]  }
  0xef   :  { %2653 = vmatpush2.bf16.msra.mxu0 %v4207_v16  ;;  %v4285_v16 = vld [vmem:[#allocation5 + $0x4b0] ss:$8 sps:$4 sm:$0xff]  }
  0xf0   :  { %2696 = vmatpush2.bf16.msra.mxu1 %v4210_v17  ;;  %2708 = vmatprep.subr.bf16.mxu0 %v4215_v22  ;;  %v4288_v17 = vld [vmem:[#allocation5 + $0x5b0] ss:$8 sps:$4 sm:$0xff]   ;;  %v4299_v22 = vld [vmem:[#allocation5 + $0x494] ss:$8 sps:$4 sm:$0xff]  }
  0xf1   :  { %2751 = vmatprep.subr.bf16.mxu1 %v4218_v23  ;;  %v4302_v23 = vld [vmem:[#allocation5 + $0x594] ss:$8 sps:$4 sm:$0xff]  }
  0xf2   :  { %2655 = vmatmul.mubr.bf16.vlgmr.msra.gmra.mxu0 %v200_v24  ;;  %v4297_v24 = vld [vmem:[#allocation5 + $0x490] ss:$8 sps:$4 sm:$0xff]  }
  0xf3   :  { %2698 = vmatmul.mubr.bf16.vlgmr.msra.gmra.mxu1 %v202_v25  ;;  %2709 = vmatpush1.bf16.msra.mxu0 %v4213_v26  ;;  %v4300_v25 = vld [vmem:[#allocation5 + $0x590] ss:$8 sps:$4 sm:$0xff]   ;;  %v4305_v26 = vld [vmem:[#allocation5 + $0x484] ss:$8 sps:$4 sm:$0xff]  }
  0xf4   :  { %2752 = vmatpush1.bf16.msra.mxu1 %v4216_v27  ;;  %2710 = vmatprep.subr.bf16.mxu0 %v4221_v28  ;;  %v4308_v27 = vld [vmem:[#allocation5 + $0x584] ss:$8 sps:$4 sm:$0xff]   ;;  %v4303_v28 = vld [vmem:[#allocation5 + $0x480] ss:$8 sps:$4 sm:$0xff]  }
  0xf5   :  { %2753 = vmatprep.subr.bf16.mxu1 %v4224_v29  ;;  %2740 = vmatprep.mubr.bf16.mxu0 %v205_v36  ;;  %v4306_v29 = vld [vmem:[#allocation5 + $0x580] ss:$8 sps:$4 sm:$0xff]  }
  0xf6   :  { %2783 = vmatprep.mubr.bf16.mxu1 %v207_v41  ;;  %v161_v36 = vld [vmem:[#allocation2 + $0x68] sm:$0xff] }
  0xf7   :  { %2711 = vmatpush1.bf16.msra.mxu0 %v4219_v30  ;;  %v156_v30 = vld [vmem:[#allocation2 + $0x40] sm:$0xff] }
  0xf8   :  { %2754 = vmatpush1.bf16.msra.mxu1 %v4222_v31  ;;  %2712 = vmatprep.subr.bf16.mxu0 %v4227_v32  ;;  %v180_v31 = vld [vmem:[#allocation2 + $0x100] sm:$0xff]  ;;  %v158_v32 = vld [vmem:[#allocation2 + $0x50] sm:$0xff] }
  0xf9   :  { %2755 = vmatprep.subr.bf16.mxu1 %v4230_v33  ;;  %v182_v33 = vld [vmem:[#allocation2 + $0x110] sm:$0xff] }
  0xfa   :  { %v206_v41 = vpack.c.bf16 %v182_v33, %v158_v32  ;;  %v4387_v32 = vld [vmem:[#allocation5 + $0x6a0] ss:$8 sps:$4 sm:$0xff]  }
  0xfb   :  { %2713 = vmatpush1.bf16.msra.mxu0 %v4225_v39  ;;  %v163_v39 = vld [vmem:[#allocation2 + $0x78] sm:$0xff]  ;;  %v4390_v33 = vld [vmem:[#allocation5 + $0x7a0] ss:$8 sps:$4 sm:$0xff]  }
  0xfc   :  { %2756 = vmatpush1.bf16.msra.mxu1 %v4228_v40  ;;  %2714 = vmatprep.subr.bf16.mxu0 %v4233_v42  ;;  %v204_v40 = vpack.c.bf16 %v180_v31, %v156_v30  ;;  %v187_v42 = vld [vmem:[#allocation2 + $0x138] sm:$0xff]  ;;  %v4389_v30 = vld [vmem:[#allocation5 + $0x6a4] ss:$8 sps:$4 sm:$0xff]  }
  0xfd   :  { %2757 = vmatprep.subr.bf16.mxu1 %v4236_v43  ;;  %v4312_v43 = vld [vmem:[#allocation5 + $0x770] ss:$8 sps:$4 sm:$0xff]   ;;  %v4392_v31 = vld [vmem:[#allocation5 + $0x7a4] ss:$8 sps:$4 sm:$0xff]  }
  0xff   :  { %2715 = vmatpush1.bf16.msra.mxu0 %v4231_v44  ;;  %v4317_v44 = vld [vmem:[#allocation5 + $0x664] ss:$8 sps:$4 sm:$0xff]  }
 0x100   :  { %2758 = vmatpush1.bf16.msra.mxu1 %v4234_v45  ;;  %2716 = vmatprep.subr.bf16.mxu0 %v4239_v46  ;;  %v4320_v45 = vld [vmem:[#allocation5 + $0x764] ss:$8 sps:$4 sm:$0xff]   ;;  %v209_v46 = vpack.c.bf16 %v185_v38, %v161_v36  ;;  %v4393_v36 = vld [vmem:[#allocation5 + $0x690] ss:$8 sps:$4 sm:$0xff]  }
 0x101   :  { %2759 = vmatprep.subr.bf16.mxu1 %v4242_v47  ;;  %v211_v47 = vpack.c.bf16 %v187_v42, %v163_v39  ;;  %v4401_v38 = vld [vmem:[#allocation5 + $0x684] ss:$8 sps:$4 sm:$0xff]  }
 0x102   :  { %v4404_v39 = vld [vmem:[#allocation5 + $0x784] ss:$8 sps:$4 sm:$0xff]  }
 0x103   :  { %2717 = vmatpush1.bf16.msra.mxu0 %v4237_v48  ;;  %v4315_v48 = vld [vmem:[#allocation5 + $0x660] ss:$8 sps:$4 sm:$0xff]  }
 0x104   :  { %2760 = vmatpush1.bf16.msra.mxu1 %v4240_v49  ;;  %2718 = vmatprep.subr.bf16.mxu0 %v4245_v50  ;;  %v4318_v49 = vld [vmem:[#allocation5 + $0x760] ss:$8 sps:$4 sm:$0xff]   ;;  %v4323_v50 = vld [vmem:[#allocation5 + $0x654] ss:$8 sps:$4 sm:$0xff]  }
 0x105   :  { %2761 = vmatprep.subr.bf16.mxu1 %v4248_v51  ;;  %v4326_v51 = vld [vmem:[#allocation5 + $0x754] ss:$8 sps:$4 sm:$0xff]   ;;  %v160_v42 = vld [vmem:[#allocation2 + $0x60] sm:$0xff] }
 0x107   :  { %2719 = vmatpush1.bf16.msra.mxu0 %v4243_v52  ;;  %v4321_v52 = vld [vmem:[#allocation5 + $0x650] ss:$8 sps:$4 sm:$0xff]  }
 0x108   :  { %2762 = vmatpush1.bf16.msra.mxu1 %v4246_v53  ;;  %2720 = vmatprep.subr.bf16.mxu0 %v4251_v54  ;;  %v4324_v53 = vld [vmem:[#allocation5 + $0x750] ss:$8 sps:$4 sm:$0xff]   ;;  %v4329_v54 = vld [vmem:[#allocation5 + $0x644] ss:$8 sps:$4 sm:$0xff]  }
 0x109   :  { %2763 = vmatprep.subr.bf16.mxu1 %v4254_v55  ;;  %v4332_v55 = vld [vmem:[#allocation5 + $0x744] ss:$8 sps:$4 sm:$0xff]  }
 0x10b   :  { %2721 = vmatpush1.bf16.msra.mxu0 %v4249_v56  ;;  %v4327_v56 = vld [vmem:[#allocation5 + $0x640] ss:$8 sps:$4 sm:$0xff]  }
 0x10c   :  { %2764 = vmatpush1.bf16.msra.mxu1 %v4252_v57  ;;  %2722 = vmatprep.subr.bf16.mxu0 %v4257_v58  ;;  %v4330_v57 = vld [vmem:[#allocation5 + $0x740] ss:$8 sps:$4 sm:$0xff]   ;;  %v4335_v58 = vld [vmem:[#allocation5 + $0x634] ss:$8 sps:$4 sm:$0xff]  }
 0x10d   :  { %2765 = vmatprep.subr.bf16.mxu1 %v4260_v59  ;;  %v4338_v59 = vld [vmem:[#allocation5 + $0x734] ss:$8 sps:$4 sm:$0xff]  }
 0x10f   :  { %2723 = vmatpush1.bf16.msra.mxu0 %v4255_v60  ;;  %v4333_v60 = vld [vmem:[#allocation5 + $0x630] ss:$8 sps:$4 sm:$0xff]  }
 0x110   :  { %2766 = vmatpush1.bf16.msra.mxu1 %v4258_v61  ;;  %2724 = vmatprep.subr.bf16.mxu0 %v4263_v62  ;;  %v4336_v61 = vld [vmem:[#allocation5 + $0x730] ss:$8 sps:$4 sm:$0xff]   ;;  %v4341_v62 = vld [vmem:[#allocation5 + $0x624] ss:$8 sps:$4 sm:$0xff]  }
 0x111   :  { %2767 = vmatprep.subr.bf16.mxu1 %v4266_v63  ;;  %v4344_v63 = vld [vmem:[#allocation5 + $0x724] ss:$8 sps:$4 sm:$0xff]  }
 0x113   :  { %2725 = vmatpush2.bf16.msra.mxu0 %v4261_v0  ;;  %v4339_v0 = vld [vmem:[#allocation5 + $0x620] ss:$8 sps:$4 sm:$0xff]  }
 0x114   :  { %2768 = vmatpush2.bf16.msra.mxu1 %v4264_v1  ;;  %2726 = vmatprep.subr.bf16.mxu0 %v4269_v2  ;;  %v4342_v1 = vld [vmem:[#allocation5 + $0x720] ss:$8 sps:$4 sm:$0xff]   ;;  %v4347_v2 = vld [vmem:[#allocation5 + $0x614] ss:$8 sps:$4 sm:$0xff]  }
 0x115   :  { %2769 = vmatprep.subr.bf16.mxu1 %v4272_v3  ;;  %v4350_v3 = vld [vmem:[#allocation5 + $0x714] ss:$8 sps:$4 sm:$0xff]  }
 0x117   :  { %2727 = vmatpush2.bf16.msra.mxu0 %v4267_v4  ;;  %v4345_v4 = vld [vmem:[#allocation5 + $0x610] ss:$8 sps:$4 sm:$0xff]  }
 0x118   :  { %2770 = vmatpush2.bf16.msra.mxu1 %v4270_v5  ;;  %2728 = vmatprep.subr.bf16.mxu0 %v4275_v6  ;;  %v4348_v5 = vld [vmem:[#allocation5 + $0x710] ss:$8 sps:$4 sm:$0xff]   ;;  %v4353_v6 = vld [vmem:[#allocation5 + $0x604] ss:$8 sps:$4 sm:$0xff]  }
 0x119   :  { %2771 = vmatprep.subr.bf16.mxu1 %v4278_v7  ;;  %v4356_v7 = vld [vmem:[#allocation5 + $0x704] ss:$8 sps:$4 sm:$0xff]  }
 0x11b   :  { %2729 = vmatpush2.bf16.msra.mxu0 %v4273_v8  ;;  %v4351_v8 = vld [vmem:[#allocation5 + $0x600] ss:$8 sps:$4 sm:$0xff]  }
 0x11c   :  { %2772 = vmatpush2.bf16.msra.mxu1 %v4276_v9  ;;  %2730 = vmatprep.subr.bf16.mxu0 %v4281_v10  ;;  %v4354_v9 = vld [vmem:[#allocation5 + $0x700] ss:$8 sps:$4 sm:$0xff]   ;;  %v4359_v10 = vld [vmem:[#allocation5 + $0x6f4] ss:$8 sps:$4 sm:$0xff]  }
 0x11d   :  { %2773 = vmatprep.subr.bf16.mxu1 %v4284_v11  ;;  %v4362_v11 = vld [vmem:[#allocation5 + $0x7f4] ss:$8 sps:$4 sm:$0xff]  }
 0x11f   :  { %2731 = vmatpush2.bf16.msra.mxu0 %v4279_v12  ;;  %v4357_v12 = vld [vmem:[#allocation5 + $0x6f0] ss:$8 sps:$4 sm:$0xff]  }
 0x120   :  { %2774 = vmatpush2.bf16.msra.mxu1 %v4282_v13  ;;  %2732 = vmatprep.subr.bf16.mxu0 %v4287_v14  ;;  %v4360_v13 = vld [vmem:[#allocation5 + $0x7f0] ss:$8 sps:$4 sm:$0xff]   ;;  %v4365_v14 = vld [vmem:[#allocation5 + $0x6e4] ss:$8 sps:$4 sm:$0xff]  }
 0x121   :  { %2775 = vmatprep.subr.bf16.mxu1 %v4290_v15  ;;  %v4368_v15 = vld [vmem:[#allocation5 + $0x7e4] ss:$8 sps:$4 sm:$0xff]  }
 0x123   :  { %2733 = vmatpush2.bf16.msra.mxu0 %v4285_v16  ;;  %v4363_v16 = vld [vmem:[#allocation5 + $0x6e0] ss:$8 sps:$4 sm:$0xff]  }
 0x124   :  { %2776 = vmatpush2.bf16.msra.mxu1 %v4288_v17  ;;  %2734 = vmatprep.subr.bf16.mxu0 %v4293_v18  ;;  %v4366_v17 = vld [vmem:[#allocation5 + $0x7e0] ss:$8 sps:$4 sm:$0xff]   ;;  %v4371_v18 = vld [vmem:[#allocation5 + $0x6d4] ss:$8 sps:$4 sm:$0xff]  }
 0x125   :  { %2777 = vmatprep.subr.bf16.mxu1 %v4296_v19  ;;  %v4374_v19 = vld [vmem:[#allocation5 + $0x7d4] ss:$8 sps:$4 sm:$0xff]  }
 0x127   :  { %2735 = vmatpush2.bf16.msra.mxu0 %v4291_v20  ;;  %v4369_v20 = vld [vmem:[#allocation5 + $0x6d0] ss:$8 sps:$4 sm:$0xff]  }
 0x128   :  { %2778 = vmatpush2.bf16.msra.mxu1 %v4294_v21  ;;  %2736 = vmatprep.subr.bf16.mxu0 %v4299_v22  ;;  %v4372_v21 = vld [vmem:[#allocation5 + $0x7d0] ss:$8 sps:$4 sm:$0xff]   ;;  %v4377_v22 = vld [vmem:[#allocation5 + $0x6c4] ss:$8 sps:$4 sm:$0xff]  }
 0x129   :  { %2779 = vmatprep.subr.bf16.mxu1 %v4302_v23  ;;  %v4380_v23 = vld [vmem:[#allocation5 + $0x7c4] ss:$8 sps:$4 sm:$0xff]  }
 0x12b   :  { %2737 = vmatpush2.bf16.msra.mxu0 %v4297_v24  ;;  %v4375_v24 = vld [vmem:[#allocation5 + $0x6c0] ss:$8 sps:$4 sm:$0xff]  }
 0x12c   :  { %2780 = vmatpush2.bf16.msra.mxu1 %v4300_v25  ;;  %2738 = vmatprep.subr.bf16.mxu0 %v4305_v26  ;;  %v4378_v25 = vld [vmem:[#allocation5 + $0x7c0] ss:$8 sps:$4 sm:$0xff]   ;;  %v4383_v26 = vld [vmem:[#allocation5 + $0x6b4] ss:$8 sps:$4 sm:$0xff]  }
 0x12d   :  { %2781 = vmatprep.subr.bf16.mxu1 %v4308_v27  ;;  %v4386_v27 = vld [vmem:[#allocation5 + $0x7b4] ss:$8 sps:$4 sm:$0xff]  }
 0x12f   :  { %2739 = vmatpush2.bf16.msra.mxu0 %v4303_v28  ;;  %v4381_v28 = vld [vmem:[#allocation5 + $0x6b0] ss:$8 sps:$4 sm:$0xff]  }
 0x130   :  { %2782 = vmatpush2.bf16.msra.mxu1 %v4306_v29  ;;  %2794 = vmatprep.subr.bf16.mxu0 %v4311_v34  ;;  %v4384_v29 = vld [vmem:[#allocation5 + $0x7b0] ss:$8 sps:$4 sm:$0xff]   ;;  %v4395_v34 = vld [vmem:[#allocation5 + $0x694] ss:$8 sps:$4 sm:$0xff]  }
 0x131   :  { %2837 = vmatprep.subr.bf16.mxu1 %v4314_v35  ;;  %v4398_v35 = vld [vmem:[#allocation5 + $0x794] ss:$8 sps:$4 sm:$0xff]  }
 0x132   :  { %2741 = vmatmul.mubr.bf16.vlgmr.msra.gmra.mxu0 %v204_v40  ;;  %v4399_v40 = vld [vmem:[#allocation5 + $0x680] ss:$8 sps:$4 sm:$0xff]  }
 0x133   :  { %2784 = vmatmul.mubr.bf16.vlgmr.msra.gmra.mxu1 %v206_v41  ;;  %2795 = vmatpush1.bf16.msra.mxu0 %v4309_v37  ;;  %v4396_v37 = vld [vmem:[#allocation5 + $0x790] ss:$8 sps:$4 sm:$0xff]   ;;  %v4402_v41 = vld [vmem:[#allocation5 + $0x780] ss:$8 sps:$4 sm:$0xff]  }
 0x134   :  { %2838 = vmatpush1.bf16.msra.mxu1 %v4312_v43  ;;  %2796 = vmatprep.subr.bf16.mxu0 %v4317_v44  ;;  %v184_v43 = vld [vmem:[#allocation2 + $0x120] sm:$0xff]  ;;  %v162_v44 = vld [vmem:[#allocation2 + $0x70] sm:$0xff] }
 0x135   :  { %2839 = vmatprep.subr.bf16.mxu1 %v4320_v45  ;;  %2826 = vmatprep.mubr.bf16.mxu0 %v209_v46  ;;  %v186_v45 = vld [vmem:[#allocation2 + $0x130] sm:$0xff] }
 0x136   :  { %2869 = vmatprep.mubr.bf16.mxu1 %v211_v47  ;;  %v4407_v46 = vld [vmem:[#allocation5 + $0x874] ss:$8 sps:$4 sm:$0xff]  }
 0x137   :  { %2797 = vmatpush1.bf16.msra.mxu0 %v4315_v48  ;;  %v4410_v47 = vld [vmem:[#allocation5 + $0x974] ss:$8 sps:$4 sm:$0xff]   ;;  %v165_v48 = vld [vmem:[#allocation2 + $0x88] sm:$0xff] }
 0x138   :  { %2840 = vmatpush1.bf16.msra.mxu1 %v4318_v49  ;;  %2798 = vmatprep.subr.bf16.mxu0 %v4323_v50  ;;  %v4405_v49 = vld [vmem:[#allocation5 + $0x870] ss:$8 sps:$4 sm:$0xff]   ;;  %v189_v50 = vld [vmem:[#allocation2 + $0x148] sm:$0xff] }
 0x139   :  { %2841 = vmatprep.subr.bf16.mxu1 %v4326_v51  ;;  %v167_v51 = vld [vmem:[#allocation2 + $0x98] sm:$0xff] }
 0x13b   :  { %2799 = vmatpush1.bf16.msra.mxu0 %v4321_v52  ;;  %v208_v52 = vpack.c.bf16 %v184_v43, %v160_v42  ;;  %v4485_v42 = vld [vmem:[#allocation5 + $0x8a4] ss:$8 sps:$4 sm:$0xff]  }
 0x13c   :  { %2842 = vmatpush1.bf16.msra.mxu1 %v4324_v53  ;;  %2800 = vmatprep.subr.bf16.mxu0 %v4329_v54  ;;  %v210_v53 = vpack.c.bf16 %v186_v45, %v162_v44  ;;  %v191_v54 = vld [vmem:[#allocation2 + $0x158] sm:$0xff]  ;;  %v4488_v43 = vld [vmem:[#allocation5 + $0x9a4] ss:$8 sps:$4 sm:$0xff]   ;;  %v4483_v44 = vld [vmem:[#allocation5 + $0x8a0] ss:$8 sps:$4 sm:$0xff]  }
 0x13d   :  { %2843 = vmatprep.subr.bf16.mxu1 %v4332_v55  ;;  %v4408_v55 = vld [vmem:[#allocation5 + $0x970] ss:$8 sps:$4 sm:$0xff]   ;;  %v4486_v45 = vld [vmem:[#allocation5 + $0x9a0] ss:$8 sps:$4 sm:$0xff]  }
 0x13f   :  { %2801 = vmatpush1.bf16.msra.mxu0 %v4327_v56  ;;  %v4413_v56 = vld [vmem:[#allocation5 + $0x864] ss:$8 sps:$4 sm:$0xff]  }
 0x140   :  { %2844 = vmatpush1.bf16.msra.mxu1 %v4330_v57  ;;  %2802 = vmatprep.subr.bf16.mxu0 %v4335_v58  ;;  %v4416_v57 = vld [vmem:[#allocation5 + $0x964] ss:$8 sps:$4 sm:$0xff]   ;;  %v213_v58 = vpack.c.bf16 %v189_v50, %v165_v48  ;;  %v4489_v48 = vld [vmem:[#allocation5 + $0x890] ss:$8 sps:$4 sm:$0xff]  }
 0x141   :  { %2845 = vmatprep.subr.bf16.mxu1 %v4338_v59  ;;  %v215_v59 = vpack.c.bf16 %v191_v54, %v167_v51  ;;  %v4497_v50 = vld [vmem:[#allocation5 + $0x884] ss:$8 sps:$4 sm:$0xff]  }
 0x142   :  { %v4500_v51 = vld [vmem:[#allocation5 + $0x984] ss:$8 sps:$4 sm:$0xff]  }
 0x143   :  { %2803 = vmatpush1.bf16.msra.mxu0 %v4333_v60  ;;  %v4411_v60 = vld [vmem:[#allocation5 + $0x860] ss:$8 sps:$4 sm:$0xff]  }
 0x144   :  { %2846 = vmatpush1.bf16.msra.mxu1 %v4336_v61  ;;  %2804 = vmatprep.subr.bf16.mxu0 %v4341_v62  ;;  %v4414_v61 = vld [vmem:[#allocation5 + $0x960] ss:$8 sps:$4 sm:$0xff]   ;;  %v4419_v62 = vld [vmem:[#allocation5 + $0x854] ss:$8 sps:$4 sm:$0xff]  }
 0x145   :  { %2847 = vmatprep.subr.bf16.mxu1 %v4344_v63  ;;  %v4422_v63 = vld [vmem:[#allocation5 + $0x954] ss:$8 sps:$4 sm:$0xff]   ;;  %v164_v54 = vld [vmem:[#allocation2 + $0x80] sm:$0xff] }
 0x147   :  { %2805 = vmatpush1.bf16.msra.mxu0 %v4339_v0  ;;  %v4417_v0 = vld [vmem:[#allocation5 + $0x850] ss:$8 sps:$4 sm:$0xff]  }
 0x148   :  { %2848 = vmatpush1.bf16.msra.mxu1 %v4342_v1  ;;  %2806 = vmatprep.subr.bf16.mxu0 %v4347_v2  ;;  %v4420_v1 = vld [vmem:[#allocation5 + $0x950] ss:$8 sps:$4 sm:$0xff]   ;;  %v4425_v2 = vld [vmem:[#allocation5 + $0x844] ss:$8 sps:$4 sm:$0xff]  }
 0x149   :  { %2849 = vmatprep.subr.bf16.mxu1 %v4350_v3  ;;  %v4428_v3 = vld [vmem:[#allocation5 + $0x944] ss:$8 sps:$4 sm:$0xff]  }
 0x14b   :  { %2807 = vmatpush1.bf16.msra.mxu0 %v4345_v4  ;;  %v4423_v4 = vld [vmem:[#allocation5 + $0x840] ss:$8 sps:$4 sm:$0xff]  }
 0x14c   :  { %2850 = vmatpush1.bf16.msra.mxu1 %v4348_v5  ;;  %2808 = vmatprep.subr.bf16.mxu0 %v4353_v6  ;;  %v4426_v5 = vld [vmem:[#allocation5 + $0x940] ss:$8 sps:$4 sm:$0xff]   ;;  %v4431_v6 = vld [vmem:[#allocation5 + $0x834] ss:$8 sps:$4 sm:$0xff]  }
 0x14d   :  { %2851 = vmatprep.subr.bf16.mxu1 %v4356_v7  ;;  %v4434_v7 = vld [vmem:[#allocation5 + $0x934] ss:$8 sps:$4 sm:$0xff]  }
 0x14f   :  { %2809 = vmatpush1.bf16.msra.mxu0 %v4351_v8  ;;  %v4429_v8 = vld [vmem:[#allocation5 + $0x830] ss:$8 sps:$4 sm:$0xff]  }
 0x150   :  { %2852 = vmatpush1.bf16.msra.mxu1 %v4354_v9  ;;  %2810 = vmatprep.subr.bf16.mxu0 %v4359_v10  ;;  %v4432_v9 = vld [vmem:[#allocation5 + $0x930] ss:$8 sps:$4 sm:$0xff]   ;;  %v4437_v10 = vld [vmem:[#allocation5 + $0x824] ss:$8 sps:$4 sm:$0xff]  }
 0x151   :  { %2853 = vmatprep.subr.bf16.mxu1 %v4362_v11  ;;  %v4440_v11 = vld [vmem:[#allocation5 + $0x924] ss:$8 sps:$4 sm:$0xff]  }
 0x153   :  { %2811 = vmatpush2.bf16.msra.mxu0 %v4357_v12  ;;  %v4435_v12 = vld [vmem:[#allocation5 + $0x820] ss:$8 sps:$4 sm:$0xff]  }
 0x154   :  { %2854 = vmatpush2.bf16.msra.mxu1 %v4360_v13  ;;  %2812 = vmatprep.subr.bf16.mxu0 %v4365_v14  ;;  %v4438_v13 = vld [vmem:[#allocation5 + $0x920] ss:$8 sps:$4 sm:$0xff]   ;;  %v4443_v14 = vld [vmem:[#allocation5 + $0x814] ss:$8 sps:$4 sm:$0xff]  }
 0x155   :  { %2855 = vmatprep.subr.bf16.mxu1 %v4368_v15  ;;  %v4446_v15 = vld [vmem:[#allocation5 + $0x914] ss:$8 sps:$4 sm:$0xff]  }
 0x157   :  { %2813 = vmatpush2.bf16.msra.mxu0 %v4363_v16  ;;  %v4441_v16 = vld [vmem:[#allocation5 + $0x810] ss:$8 sps:$4 sm:$0xff]  }
 0x158   :  { %2856 = vmatpush2.bf16.msra.mxu1 %v4366_v17  ;;  %2814 = vmatprep.subr.bf16.mxu0 %v4371_v18  ;;  %v4444_v17 = vld [vmem:[#allocation5 + $0x910] ss:$8 sps:$4 sm:$0xff]   ;;  %v4449_v18 = vld [vmem:[#allocation5 + $0x804] ss:$8 sps:$4 sm:$0xff]  }
 0x159   :  { %2857 = vmatprep.subr.bf16.mxu1 %v4374_v19  ;;  %v4452_v19 = vld [vmem:[#allocation5 + $0x904] ss:$8 sps:$4 sm:$0xff]  }
 0x15b   :  { %2815 = vmatpush2.bf16.msra.mxu0 %v4369_v20  ;;  %v4447_v20 = vld [vmem:[#allocation5 + $0x800] ss:$8 sps:$4 sm:$0xff]  }
 0x15c   :  { %2858 = vmatpush2.bf16.msra.mxu1 %v4372_v21  ;;  %2816 = vmatprep.subr.bf16.mxu0 %v4377_v22  ;;  %v4450_v21 = vld [vmem:[#allocation5 + $0x900] ss:$8 sps:$4 sm:$0xff]   ;;  %v4455_v22 = vld [vmem:[#allocation5 + $0x8f4] ss:$8 sps:$4 sm:$0xff]  }
 0x15d   :  { %2859 = vmatprep.subr.bf16.mxu1 %v4380_v23  ;;  %v4458_v23 = vld [vmem:[#allocation5 + $0x9f4] ss:$8 sps:$4 sm:$0xff]  }
 0x15f   :  { %2817 = vmatpush2.bf16.msra.mxu0 %v4375_v24  ;;  %v4453_v24 = vld [vmem:[#allocation5 + $0x8f0] ss:$8 sps:$4 sm:$0xff]  }
 0x160   :  { %2860 = vmatpush2.bf16.msra.mxu1 %v4378_v25  ;;  %2818 = vmatprep.subr.bf16.mxu0 %v4383_v26  ;;  %v4456_v25 = vld [vmem:[#allocation5 + $0x9f0] ss:$8 sps:$4 sm:$0xff]   ;;  %v4461_v26 = vld [vmem:[#allocation5 + $0x8e4] ss:$8 sps:$4 sm:$0xff]  }
 0x161   :  { %2861 = vmatprep.subr.bf16.mxu1 %v4386_v27  ;;  %v4464_v27 = vld [vmem:[#allocation5 + $0x9e4] ss:$8 sps:$4 sm:$0xff]  }
 0x163   :  { %2819 = vmatpush2.bf16.msra.mxu0 %v4381_v28  ;;  %v4459_v28 = vld [vmem:[#allocation5 + $0x8e0] ss:$8 sps:$4 sm:$0xff]  }
 0x164   :  { %2862 = vmatpush2.bf16.msra.mxu1 %v4384_v29  ;;  %2820 = vmatprep.subr.bf16.mxu0 %v4389_v30  ;;  %v4462_v29 = vld [vmem:[#allocation5 + $0x9e0] ss:$8 sps:$4 sm:$0xff]   ;;  %v4467_v30 = vld [vmem:[#allocation5 + $0x8d4] ss:$8 sps:$4 sm:$0xff]  }
 0x165   :  { %2863 = vmatprep.subr.bf16.mxu1 %v4392_v31  ;;  %v4470_v31 = vld [vmem:[#allocation5 + $0x9d4] ss:$8 sps:$4 sm:$0xff]  }
 0x167   :  { %2821 = vmatpush2.bf16.msra.mxu0 %v4387_v32  ;;  %v4465_v32 = vld [vmem:[#allocation5 + $0x8d0] ss:$8 sps:$4 sm:$0xff]  }
 0x168   :  { %2864 = vmatpush2.bf16.msra.mxu1 %v4390_v33  ;;  %2822 = vmatprep.subr.bf16.mxu0 %v4395_v34  ;;  %v4468_v33 = vld [vmem:[#allocation5 + $0x9d0] ss:$8 sps:$4 sm:$0xff]   ;;  %v4473_v34 = vld [vmem:[#allocation5 + $0x8c4] ss:$8 sps:$4 sm:$0xff]  }
 0x169   :  { %2865 = vmatprep.subr.bf16.mxu1 %v4398_v35  ;;  %v4476_v35 = vld [vmem:[#allocation5 + $0x9c4] ss:$8 sps:$4 sm:$0xff]  }
 0x16b   :  { %2823 = vmatpush2.bf16.msra.mxu0 %v4393_v36  ;;  %v4471_v36 = vld [vmem:[#allocation5 + $0x8c0] ss:$8 sps:$4 sm:$0xff]  }
 0x16c   :  { %2866 = vmatpush2.bf16.msra.mxu1 %v4396_v37  ;;  %2824 = vmatprep.subr.bf16.mxu0 %v4401_v38  ;;  %v4474_v37 = vld [vmem:[#allocation5 + $0x9c0] ss:$8 sps:$4 sm:$0xff]   ;;  %v4479_v38 = vld [vmem:[#allocation5 + $0x8b4] ss:$8 sps:$4 sm:$0xff]  }
 0x16d   :  { %2867 = vmatprep.subr.bf16.mxu1 %v4404_v39  ;;  %v4482_v39 = vld [vmem:[#allocation5 + $0x9b4] ss:$8 sps:$4 sm:$0xff]  }
 0x16f   :  { %2825 = vmatpush2.bf16.msra.mxu0 %v4399_v40  ;;  %v4477_v40 = vld [vmem:[#allocation5 + $0x8b0] ss:$8 sps:$4 sm:$0xff]  }
 0x170   :  { %2868 = vmatpush2.bf16.msra.mxu1 %v4402_v41  ;;  %2880 = vmatprep.subr.bf16.mxu0 %v4407_v46  ;;  %v4480_v41 = vld [vmem:[#allocation5 + $0x9b0] ss:$8 sps:$4 sm:$0xff]   ;;  %v4491_v46 = vld [vmem:[#allocation5 + $0x894] ss:$8 sps:$4 sm:$0xff]  }
 0x171   :  { %2923 = vmatprep.subr.bf16.mxu1 %v4410_v47  ;;  %v4494_v47 = vld [vmem:[#allocation5 + $0x994] ss:$8 sps:$4 sm:$0xff]  }
 0x172   :  { %2827 = vmatmul.mubr.bf16.vlgmr.msra.gmra.mxu0 %v208_v52  ;;  %v4495_v52 = vld [vmem:[#allocation5 + $0x880] ss:$8 sps:$4 sm:$0xff]  }
 0x173   :  { %2870 = vmatmul.mubr.bf16.vlgmr.msra.gmra.mxu1 %v210_v53  ;;  %2881 = vmatpush1.bf16.msra.mxu0 %v4405_v49  ;;  %v4492_v49 = vld [vmem:[#allocation5 + $0x990] ss:$8 sps:$4 sm:$0xff]   ;;  %v4498_v53 = vld [vmem:[#allocation5 + $0x980] ss:$8 sps:$4 sm:$0xff]  }
 0x174   :  { %2924 = vmatpush1.bf16.msra.mxu1 %v4408_v55  ;;  %2882 = vmatprep.subr.bf16.mxu0 %v4413_v56  ;;  %v188_v55 = vld [vmem:[#allocation2 + $0x140] sm:$0xff]  ;;  %v166_v56 = vld [vmem:[#allocation2 + $0x90] sm:$0xff] }
 0x175   :  { %2925 = vmatprep.subr.bf16.mxu1 %v4416_v57  ;;  %2912 = vmatprep.mubr.bf16.mxu0 %v213_v58  ;;  %v190_v57 = vld [vmem:[#allocation2 + $0x150] sm:$0xff] }
 0x176   :  { %2955 = vmatprep.mubr.bf16.mxu1 %v215_v59  ;;  %v4503_v58 = vld [vmem:[#allocation5 + $0xa74] ss:$8 sps:$4 sm:$0xff]  }
 0x177   :  { %2883 = vmatpush1.bf16.msra.mxu0 %v4411_v60  ;;  %v4506_v59 = vld [vmem:[#allocation5 + $0xb74] ss:$8 sps:$4 sm:$0xff]   ;;  %v169_v60 = vld [vmem:[#allocation2 + $0xa8] sm:$0xff] }
 0x178   :  { %2926 = vmatpush1.bf16.msra.mxu1 %v4414_v61  ;;  %2884 = vmatprep.subr.bf16.mxu0 %v4419_v62  ;;  %v212_v61 = vpack.c.bf16 %v188_v55, %v164_v54  ;;  %v214_v62 = vpack.c.bf16 %v190_v57, %v166_v56  ;;  %v4581_v54 = vld [vmem:[#allocation5 + $0xaa4] ss:$8 sps:$4 sm:$0xff]   ;;  %v4579_v56 = vld [vmem:[#allocation5 + $0xaa0] ss:$8 sps:$4 sm:$0xff]  }
 0x179   :  { %2927 = vmatprep.subr.bf16.mxu1 %v4422_v63  ;;  %v193_v63 = vld [vmem:[#allocation2 + $0x168] sm:$0xff] }
 0x17a   :  { %v4584_v55 = vld [vmem:[#allocation5 + $0xba4] ss:$8 sps:$4 sm:$0xff]   ;;  %v4582_v57 = vld [vmem:[#allocation5 + $0xba0] ss:$8 sps:$4 sm:$0xff]  }
 0x17b   :  { %2885 = vmatpush1.bf16.msra.mxu0 %v4417_v0  ;;  %v171_v0 = vld [vmem:[#allocation2 + $0xb8] sm:$0xff] }
 0x17c   :  { %2928 = vmatpush1.bf16.msra.mxu1 %v4420_v1  ;;  %2886 = vmatprep.subr.bf16.mxu0 %v4425_v2  ;;  %v195_v1 = vld [vmem:[#allocation2 + $0x178] sm:$0xff] }
 0x17d   :  { %2929 = vmatprep.subr.bf16.mxu1 %v4428_v3  ;;  %v4501_v2 = vld [vmem:[#allocation5 + $0xa70] ss:$8 sps:$4 sm:$0xff]  }
 0x17e   :  { %v4504_v3 = vld [vmem:[#allocation5 + $0xb70] ss:$8 sps:$4 sm:$0xff]  }
 0x17f   :  { %2887 = vmatpush1.bf16.msra.mxu0 %v4423_v4  ;;  %v4509_v4 = vld [vmem:[#allocation5 + $0xa64] ss:$8 sps:$4 sm:$0xff]  }
 0x180   :  { %2930 = vmatpush1.bf16.msra.mxu1 %v4426_v5  ;;  %2888 = vmatprep.subr.bf16.mxu0 %v4431_v6  ;;  %v4512_v5 = vld [vmem:[#allocation5 + $0xb64] ss:$8 sps:$4 sm:$0xff]   ;;  %v217_v6 = vpack.c.bf16 %v193_v63, %v169_v60  ;;  %v4585_v60 = vld [vmem:[#allocation5 + $0xa90] ss:$8 sps:$4 sm:$0xff]  }
 0x181   :  { %2931 = vmatprep.subr.bf16.mxu1 %v4434_v7  ;;  %v219_v7 = vpack.c.bf16 %v195_v1, %v171_v0  ;;  %v4596_v63 = vld [vmem:[#allocation5 + $0xb84] ss:$8 sps:$4 sm:$0xff]   ;;  %v4591_v0 = vld [vmem:[#allocation5 + $0xa80] ss:$8 sps:$4 sm:$0xff]  }
 0x182   :  { %v4594_v1 = vld [vmem:[#allocation5 + $0xb80] ss:$8 sps:$4 sm:$0xff]  }
 0x183   :  { %2889 = vmatpush1.bf16.msra.mxu0 %v4429_v8  ;;  %v4507_v8 = vld [vmem:[#allocation5 + $0xa60] ss:$8 sps:$4 sm:$0xff]  }
 0x184   :  { %2932 = vmatpush1.bf16.msra.mxu1 %v4432_v9  ;;  %2890 = vmatprep.subr.bf16.mxu0 %v4437_v10  ;;  %v4510_v9 = vld [vmem:[#allocation5 + $0xb60] ss:$8 sps:$4 sm:$0xff]   ;;  %v4515_v10 = vld [vmem:[#allocation5 + $0xa54] ss:$8 sps:$4 sm:$0xff]  }
 0x185   :  { %2933 = vmatprep.subr.bf16.mxu1 %v4440_v11  ;;  %v4518_v11 = vld [vmem:[#allocation5 + $0xb54] ss:$8 sps:$4 sm:$0xff]  }
 0x187   :  { %2891 = vmatpush1.bf16.msra.mxu0 %v4435_v12  ;;  %v4513_v12 = vld [vmem:[#allocation5 + $0xa50] ss:$8 sps:$4 sm:$0xff]  }
 0x188   :  { %2934 = vmatpush1.bf16.msra.mxu1 %v4438_v13  ;;  %2892 = vmatprep.subr.bf16.mxu0 %v4443_v14  ;;  %v4516_v13 = vld [vmem:[#allocation5 + $0xb50] ss:$8 sps:$4 sm:$0xff]   ;;  %v4521_v14 = vld [vmem:[#allocation5 + $0xa44] ss:$8 sps:$4 sm:$0xff]  }
 0x189   :  { %2935 = vmatprep.subr.bf16.mxu1 %v4446_v15  ;;  %v4524_v15 = vld [vmem:[#allocation5 + $0xb44] ss:$8 sps:$4 sm:$0xff]  }
 0x18b   :  { %2893 = vmatpush1.bf16.msra.mxu0 %v4441_v16  ;;  %v4519_v16 = vld [vmem:[#allocation5 + $0xa40] ss:$8 sps:$4 sm:$0xff]  }
 0x18c   :  { %2936 = vmatpush1.bf16.msra.mxu1 %v4444_v17  ;;  %2894 = vmatprep.subr.bf16.mxu0 %v4449_v18  ;;  %v4522_v17 = vld [vmem:[#allocation5 + $0xb40] ss:$8 sps:$4 sm:$0xff]   ;;  %v4527_v18 = vld [vmem:[#allocation5 + $0xa34] ss:$8 sps:$4 sm:$0xff]  }
 0x18d   :  { %2937 = vmatprep.subr.bf16.mxu1 %v4452_v19  ;;  %v4530_v19 = vld [vmem:[#allocation5 + $0xb34] ss:$8 sps:$4 sm:$0xff]  }
 0x18f   :  { %2895 = vmatpush1.bf16.msra.mxu0 %v4447_v20  ;;  %v4525_v20 = vld [vmem:[#allocation5 + $0xa30] ss:$8 sps:$4 sm:$0xff]  }
 0x190   :  { %2938 = vmatpush1.bf16.msra.mxu1 %v4450_v21  ;;  %2896 = vmatprep.subr.bf16.mxu0 %v4455_v22  ;;  %v4528_v21 = vld [vmem:[#allocation5 + $0xb30] ss:$8 sps:$4 sm:$0xff]   ;;  %v4533_v22 = vld [vmem:[#allocation5 + $0xa24] ss:$8 sps:$4 sm:$0xff]  }
 0x191   :  { %2939 = vmatprep.subr.bf16.mxu1 %v4458_v23  ;;  %v4536_v23 = vld [vmem:[#allocation5 + $0xb24] ss:$8 sps:$4 sm:$0xff]  }
 0x193   :  { %2897 = vmatpush2.bf16.msra.mxu0 %v4453_v24  ;;  %v4531_v24 = vld [vmem:[#allocation5 + $0xa20] ss:$8 sps:$4 sm:$0xff]  }
 0x194   :  { %2940 = vmatpush2.bf16.msra.mxu1 %v4456_v25  ;;  %2898 = vmatprep.subr.bf16.mxu0 %v4461_v26  ;;  %v4534_v25 = vld [vmem:[#allocation5 + $0xb20] ss:$8 sps:$4 sm:$0xff]   ;;  %v4539_v26 = vld [vmem:[#allocation5 + $0xa14] ss:$8 sps:$4 sm:$0xff]  }
 0x195   :  { %2941 = vmatprep.subr.bf16.mxu1 %v4464_v27  ;;  %v4542_v27 = vld [vmem:[#allocation5 + $0xb14] ss:$8 sps:$4 sm:$0xff]  }
 0x197   :  { %2899 = vmatpush2.bf16.msra.mxu0 %v4459_v28  ;;  %v4537_v28 = vld [vmem:[#allocation5 + $0xa10] ss:$8 sps:$4 sm:$0xff]  }
 0x198   :  { %2942 = vmatpush2.bf16.msra.mxu1 %v4462_v29  ;;  %2900 = vmatprep.subr.bf16.mxu0 %v4467_v30  ;;  %v4540_v29 = vld [vmem:[#allocation5 + $0xb10] ss:$8 sps:$4 sm:$0xff]   ;;  %v4545_v30 = vld [vmem:[#allocation5 + $0xa04] ss:$8 sps:$4 sm:$0xff]  }
 0x199   :  { %2943 = vmatprep.subr.bf16.mxu1 %v4470_v31  ;;  %v4548_v31 = vld [vmem:[#allocation5 + $0xb04] ss:$8 sps:$4 sm:$0xff]  }
 0x19b   :  { %2901 = vmatpush2.bf16.msra.mxu0 %v4465_v32  ;;  %v4543_v32 = vld [vmem:[#allocation5 + $0xa00] ss:$8 sps:$4 sm:$0xff]  }
 0x19c   :  { %2944 = vmatpush2.bf16.msra.mxu1 %v4468_v33  ;;  %2902 = vmatprep.subr.bf16.mxu0 %v4473_v34  ;;  %v4546_v33 = vld [vmem:[#allocation5 + $0xb00] ss:$8 sps:$4 sm:$0xff]   ;;  %v4551_v34 = vld [vmem:[#allocation5 + $0xaf4] ss:$8 sps:$4 sm:$0xff]  }
 0x19d   :  { %2945 = vmatprep.subr.bf16.mxu1 %v4476_v35  ;;  %v4554_v35 = vld [vmem:[#allocation5 + $0xbf4] ss:$8 sps:$4 sm:$0xff]  }
 0x19f   :  { %2903 = vmatpush2.bf16.msra.mxu0 %v4471_v36  ;;  %v4549_v36 = vld [vmem:[#allocation5 + $0xaf0] ss:$8 sps:$4 sm:$0xff]  }
 0x1a0   :  { %2946 = vmatpush2.bf16.msra.mxu1 %v4474_v37  ;;  %2904 = vmatprep.subr.bf16.mxu0 %v4479_v38  ;;  %v4552_v37 = vld [vmem:[#allocation5 + $0xbf0] ss:$8 sps:$4 sm:$0xff]   ;;  %v4557_v38 = vld [vmem:[#allocation5 + $0xae4] ss:$8 sps:$4 sm:$0xff]  }
 0x1a1   :  { %2947 = vmatprep.subr.bf16.mxu1 %v4482_v39  ;;  %v4560_v39 = vld [vmem:[#allocation5 + $0xbe4] ss:$8 sps:$4 sm:$0xff]  }
 0x1a3   :  { %2905 = vmatpush2.bf16.msra.mxu0 %v4477_v40  ;;  %v4555_v40 = vld [vmem:[#allocation5 + $0xae0] ss:$8 sps:$4 sm:$0xff]  }
 0x1a4   :  { %2948 = vmatpush2.bf16.msra.mxu1 %v4480_v41  ;;  %2906 = vmatprep.subr.bf16.mxu0 %v4485_v42  ;;  %v4558_v41 = vld [vmem:[#allocation5 + $0xbe0] ss:$8 sps:$4 sm:$0xff]   ;;  %v4563_v42 = vld [vmem:[#allocation5 + $0xad4] ss:$8 sps:$4 sm:$0xff]  }
 0x1a5   :  { %2949 = vmatprep.subr.bf16.mxu1 %v4488_v43  ;;  %v4566_v43 = vld [vmem:[#allocation5 + $0xbd4] ss:$8 sps:$4 sm:$0xff]  }
 0x1a7   :  { %2907 = vmatpush2.bf16.msra.mxu0 %v4483_v44  ;;  %v4561_v44 = vld [vmem:[#allocation5 + $0xad0] ss:$8 sps:$4 sm:$0xff]  }
 0x1a8   :  { %2950 = vmatpush2.bf16.msra.mxu1 %v4486_v45  ;;  %2908 = vmatprep.subr.bf16.mxu0 %v4491_v46  ;;  %v4564_v45 = vld [vmem:[#allocation5 + $0xbd0] ss:$8 sps:$4 sm:$0xff]   ;;  %v4569_v46 = vld [vmem:[#allocation5 + $0xac4] ss:$8 sps:$4 sm:$0xff]  }
 0x1a9   :  { %2951 = vmatprep.subr.bf16.mxu1 %v4494_v47  ;;  %v4572_v47 = vld [vmem:[#allocation5 + $0xbc4] ss:$8 sps:$4 sm:$0xff]  }
 0x1ab   :  { %2909 = vmatpush2.bf16.msra.mxu0 %v4489_v48  ;;  %v4567_v48 = vld [vmem:[#allocation5 + $0xac0] ss:$8 sps:$4 sm:$0xff]  }
 0x1ac   :  { %2952 = vmatpush2.bf16.msra.mxu1 %v4492_v49  ;;  %2910 = vmatprep.subr.bf16.mxu0 %v4497_v50  ;;  %v4570_v49 = vld [vmem:[#allocation5 + $0xbc0] ss:$8 sps:$4 sm:$0xff]   ;;  %v4575_v50 = vld [vmem:[#allocation5 + $0xab4] ss:$8 sps:$4 sm:$0xff]  }
 0x1ad   :  { %2953 = vmatprep.subr.bf16.mxu1 %v4500_v51  ;;  %v4578_v51 = vld [vmem:[#allocation5 + $0xbb4] ss:$8 sps:$4 sm:$0xff]  }
 0x1af   :  { %2911 = vmatpush2.bf16.msra.mxu0 %v4495_v52  ;;  %v4573_v52 = vld [vmem:[#allocation5 + $0xab0] ss:$8 sps:$4 sm:$0xff]  }
 0x1b0   :  { %2954 = vmatpush2.bf16.msra.mxu1 %v4498_v53  ;;  %2966 = vmatprep.subr.bf16.mxu0 %v4503_v58  ;;  %v4576_v53 = vld [vmem:[#allocation5 + $0xbb0] ss:$8 sps:$4 sm:$0xff]   ;;  %v4587_v58 = vld [vmem:[#allocation5 + $0xa94] ss:$8 sps:$4 sm:$0xff]  }
 0x1b1   :  { %3009 = vmatprep.subr.bf16.mxu1 %v4506_v59  ;;  %v4590_v59 = vld [vmem:[#allocation5 + $0xb94] ss:$8 sps:$4 sm:$0xff]  }
 0x1b2   :  { %2913 = vmatmul.mubr.bf16.vlgmr.msra.gmra.mxu0 %v212_v61  ;;  %v4588_v61 = vld [vmem:[#allocation5 + $0xb90] ss:$8 sps:$4 sm:$0xff]  }
 0x1b3   :  { %2956 = vmatmul.mubr.bf16.vlgmr.msra.gmra.mxu1 %v214_v62  ;;  %2967 = vmatpush1.bf16.msra.mxu0 %v4501_v2  ;;  %v4593_v62 = vld [vmem:[#allocation5 + $0xa84] ss:$8 sps:$4 sm:$0xff]  }
 0x1b4   :  { %3010 = vmatpush1.bf16.msra.mxu1 %v4504_v3  ;;  %2968 = vmatprep.subr.bf16.mxu0 %v4509_v4  ;;  %v168_v2 = vld [vmem:[#allocation2 + $0xa0] sm:$0xff]  ;;  %v170_v4 = vld [vmem:[#allocation2 + $0xb0] sm:$0xff] }
 0x1b5   :  { %3011 = vmatprep.subr.bf16.mxu1 %v4512_v5  ;;  %2998 = vmatprep.mubr.bf16.mxu0 %v217_v6  ;;  %v192_v3 = vld [vmem:[#allocation2 + $0x160] sm:$0xff]  ;;  %v194_v5 = vld [vmem:[#allocation2 + $0x170] sm:$0xff] }
 0x1b6   :  { %3041 = vmatprep.mubr.bf16.mxu1 %v219_v7  ;;  %v216_v6 = vpack.c.bf16 %v192_v3, %v168_v2  ;;  %v218_v7 = vpack.c.bf16 %v194_v5, %v170_v4 }
 0x1b7   :  { %2969 = vmatpush1.bf16.msra.mxu0 %v4507_v8  ;;  %v4597_v8 = vld [vmem:[#allocation8 + $0x78] sm:$0xff]  }
 0x1b8   :  { %3012 = vmatpush1.bf16.msra.mxu1 %v4510_v9  ;;  %2970 = vmatprep.subr.bf16.mxu0 %v4515_v10  ;;  %v4598_v9 = vld [vmem:[#allocation8 + $0x38] sm:$0xff]   ;;  %v4599_v10 = vld [vmem:[#allocation8 + $0x70] sm:$0xff]  }
 0x1b9   :  { %3013 = vmatprep.subr.bf16.mxu1 %v4518_v11  ;;  %v4600_v11 = vld [vmem:[#allocation8 + $0x30] sm:$0xff]  }
 0x1bb   :  { %2971 = vmatpush1.bf16.msra.mxu0 %v4513_v12  ;;  %v4601_v12 = vld [vmem:[#allocation8 + $0x68] sm:$0xff]  }
 0x1bc   :  { %3014 = vmatpush1.bf16.msra.mxu1 %v4516_v13  ;;  %2972 = vmatprep.subr.bf16.mxu0 %v4521_v14  ;;  %v4602_v13 = vld [vmem:[#allocation8 + $0x28] sm:$0xff]   ;;  %v4603_v14 = vld [vmem:[#allocation8 + $0x60] sm:$0xff]  }
 0x1bd   :  { %3015 = vmatprep.subr.bf16.mxu1 %v4524_v15  ;;  %v4604_v15 = vld [vmem:[#allocation8 + $0x20] sm:$0xff]  }
 0x1bf   :  { %2973 = vmatpush1.bf16.msra.mxu0 %v4519_v16  ;;  %v4605_v16 = vld [vmem:[#allocation8 + $0x58] sm:$0xff]  }
 0x1c0   :  { %3016 = vmatpush1.bf16.msra.mxu1 %v4522_v17  ;;  %2974 = vmatprep.subr.bf16.mxu0 %v4527_v18  ;;  %v4606_v17 = vld [vmem:[#allocation8 + $0x18] sm:$0xff]   ;;  %v4607_v18 = vld [vmem:[#allocation8 + $0x50] sm:$0xff]  }
 0x1c1   :  { %3017 = vmatprep.subr.bf16.mxu1 %v4530_v19  ;;  %v4608_v19 = vld [vmem:[#allocation8 + $0x10] sm:$0xff]  }
 0x1c3   :  { %2975 = vmatpush1.bf16.msra.mxu0 %v4525_v20  ;;  %v4609_v20 = vld [vmem:[#allocation8 + $0x48] sm:$0xff]  }
 0x1c4   :  { %3018 = vmatpush1.bf16.msra.mxu1 %v4528_v21  ;;  %2976 = vmatprep.subr.bf16.mxu0 %v4533_v22  ;;  %v4610_v21 = vld [vmem:[#allocation8 + $0x8] sm:$0xff]   ;;  %v4611_v22 = vld [vmem:[#allocation8 + $0x40] sm:$0xff]  }
 0x1c5   :  { %3019 = vmatprep.subr.bf16.mxu1 %v4536_v23  ;;  %v4612_v23 = vld [vmem:[#allocation8] sm:$0xff]  }
 0x1c7   :  { %2977 = vmatpush1.bf16.msra.mxu0 %v4531_v24  ;;  %v4613_v24 = vld [vmem:[#allocation11 + $0x38] sm:$0xff]  }
 0x1c8   :  { %3020 = vmatpush1.bf16.msra.mxu1 %v4534_v25  ;;  %2978 = vmatprep.subr.bf16.mxu0 %v4539_v26  ;;  %v4856_v25 = vmov 0.0   ;;  %v4614_v26 = vld [vmem:[#allocation11 + $0x30] sm:$0xff]  }
 0x1c9   :  { %3021 = vmatprep.subr.bf16.mxu1 %v4542_v27  ;;  %v4615_v27 = vld [vmem:[#allocation11 + $0x28] sm:$0xff]  }
 0x1cb   :  { %2979 = vmatpush1.bf16.msra.mxu0 %v4537_v28  ;;  %v4616_v28 = vld [vmem:[#allocation11 + $0x20] sm:$0xff]  }
 0x1cc   :  { %3022 = vmatpush1.bf16.msra.mxu1 %v4540_v29  ;;  %2980 = vmatprep.subr.bf16.mxu0 %v4545_v30  ;;  %v2570_v29 = vpop.f32.mrf.mxu0  ;;  %v2613_v30 = vpop.f32.mrf.mxu1 }
 0x1cd   :  { %3023 = vmatprep.subr.bf16.mxu1 %v4548_v31 }
 0x1ce   :  { %v2572_v31 = vpop.f32.mrf.mxu0 }
 0x1cf   :  { %2981 = vmatpush1.bf16.msra.mxu0 %v4543_v32  ;;  %v2615_v32 = vpop.f32.mrf.mxu1 }
 0x1d0   :  { %3024 = vmatpush1.bf16.msra.mxu1 %v4546_v33  ;;  %2982 = vmatprep.subr.bf16.mxu0 %v4551_v34  ;;  %v2574_v33 = vpop.f32.mrf.mxu0 }
 0x1d1   :  { %3025 = vmatprep.subr.bf16.mxu1 %v4554_v35  ;;  %v2617_v34 = vpop.f32.mrf.mxu1 }
 0x1d2   :  { %v2576_v35 = vpop.f32.mrf.mxu0 }
 0x1d3   :  { %2983 = vmatpush2.bf16.msra.mxu0 %v4549_v36  ;;  %v2619_v36 = vpop.f32.mrf.mxu1 }
 0x1d4   :  { %3026 = vmatpush2.bf16.msra.mxu1 %v4552_v37  ;;  %2984 = vmatprep.subr.bf16.mxu0 %v4557_v38  ;;  %v2656_v37 = vpop.f32.mrf.mxu0 }
 0x1d5   :  { %3027 = vmatprep.subr.bf16.mxu1 %v4560_v39  ;;  %v2699_v38 = vpop.f32.mrf.mxu1 }
 0x1d6   :  { %v2658_v39 = vpop.f32.mrf.mxu0 }
 0x1d7   :  { %2985 = vmatpush2.bf16.msra.mxu0 %v4555_v40  ;;  %v2701_v40 = vpop.f32.mrf.mxu1 }
 0x1d8   :  { %3028 = vmatpush2.bf16.msra.mxu1 %v4558_v41  ;;  %2986 = vmatprep.subr.bf16.mxu0 %v4563_v42  ;;  %v2660_v41 = vpop.f32.mrf.mxu0 }
 0x1d9   :  { %3029 = vmatprep.subr.bf16.mxu1 %v4566_v43  ;;  %v2703_v42 = vpop.f32.mrf.mxu1 }
 0x1da   :  { %v2662_v43 = vpop.f32.mrf.mxu0 }
 0x1db   :  { %2987 = vmatpush2.bf16.msra.mxu0 %v4561_v44  ;;  %v2705_v44 = vpop.f32.mrf.mxu1 }
 0x1dc   :  { %3030 = vmatpush2.bf16.msra.mxu1 %v4564_v45  ;;  %2988 = vmatprep.subr.bf16.mxu0 %v4569_v46  ;;  %v606_v45 = vlaneseq }
 0x1dd   :  { %3031 = vmatprep.subr.bf16.mxu1 %v4572_v47 }
 0x1df   :  { %2989 = vmatpush2.bf16.msra.mxu0 %v4567_v48  ;;  %v607_v48 = vshrl.u32 %v606_v45, 7 }
 0x1e0   :  { %3032 = vmatpush2.bf16.msra.mxu1 %v4570_v49  ;;  %2990 = vmatprep.subr.bf16.mxu0 %v4575_v50 }
 0x1e1   :  { %3033 = vmatprep.subr.bf16.mxu1 %v4578_v51  ;;  %v612_v51 = vsub.s32 1, %v607_v48 }
 0x1e3   :  { %2991 = vmatpush2.bf16.msra.mxu0 %v4573_v52  ;;  %v604_v52 = vld [vmem:[#allocation7] sm:$0x3] }
 0x1e4   :  { %3034 = vmatpush2.bf16.msra.mxu1 %v4576_v53  ;;  %2992 = vmatprep.subr.bf16.mxu0 %v4581_v54  ;;  %v608_v53 = vsub.s32 0, %v607_v48 }
 0x1e5   :  { %3035 = vmatprep.subr.bf16.mxu1 %v4584_v55 }
 0x1e7   :  { %2993 = vmatpush2.bf16.msra.mxu0 %v4579_v56  ;;  %v613_v56 = vrot.slane %v604_v52, %v612_v51 }
 0x1e8   :  { %3036 = vmatpush2.bf16.msra.mxu1 %v4582_v57  ;;  %2994 = vmatprep.subr.bf16.mxu0 %v4587_v58  ;;  %v609_v57 = vrot.slane %v604_v52, %v608_v53 }
 0x1e9   :  { %3037 = vmatprep.subr.bf16.mxu1 %v4590_v59  ;;  %v2577_v4 = vadd.f32 %v2576_v35, %v613_v56 }
 0x1eb   :  { %2995 = vmatpush2.bf16.msra.mxu0 %v4585_v60 }
 0x1ec   :  { %3038 = vmatpush2.bf16.msra.mxu1 %v4588_v61  ;;  %2996 = vmatprep.subr.bf16.mxu0 %v4593_v62  ;;  %v2573_v62 = vadd.f32 %v2572_v31, %v613_v56 }
 0x1ed   :  { %3039 = vmatprep.subr.bf16.mxu1 %v4596_v63  ;;  %v2571_v63 = vadd.f32 %v2570_v29, %v609_v57 }
 0x1ee   :  { %v2616_v3 = vadd.f32 %v2615_v32, %v2573_v62 }
 0x1ef   :  { %2997 = vmatpush2.bf16.msra.mxu0 %v4591_v0  ;;  %v2575_v0 = vadd.f32 %v2574_v33, %v609_v57  ;;  %v2614_v5 = vadd.f32 %v2613_v30, %v2571_v63 }
 0x1f0   :  { %3040 = vmatpush2.bf16.msra.mxu1 %v4594_v1  ;;  %3923 = vmatprep.subr.bf16.mxu0 %v4597_v8 }
 0x1f1   :  { %3963 = vmatprep.subr.bf16.mxu1 %v4856_v25  ;;  %v2657_v8 = vadd.f32 %v2656_v37, %v2614_v5 }
 0x1f2   :  { %2999 = vmatmul.mubr.bf16.vlgmr.msra.gmra.mxu0 %v216_v6  ;;  %v2742_v46 = vpop.f32.mrf.mxu0  ;;  %v2618_v6 = vadd.f32 %v2617_v34, %v2575_v0 }
 0x1f3   :  { %3042 = vmatmul.mubr.bf16.vlgmr.msra.gmra.mxu1 %v218_v7  ;;  %3924 = vmatpush3.bf16.msra.mxu0 %v4598_v9  ;;  %v2785_v47 = vpop.f32.mrf.mxu1  ;;  %v2659_v7 = vadd.f32 %v2658_v39, %v2616_v3 }
 0x1f4   :  { %3925 = vmatprep.subr.bf16.mxu0 %v4599_v10  ;;  %3964 = vmatpush3.bf16.msra.mxu1 %v4613_v24  ;;  %v2744_v49 = vpop.f32.mrf.mxu0 }
 0x1f5   :  { %3965 = vmatprep.subr.bf16.mxu1 %v4856_v25  ;;  %v2787_v50 = vpop.f32.mrf.mxu1  ;;  %3979 = vmatprep.mubr.msk.bf16.mxu1 %vm4857_vm0, %v4856_v25 }
 0x1f6   :  { %v2746_v54 = vpop.f32.mrf.mxu0 }
 0x1f7   :  { %3926 = vmatpush3.bf16.msra.mxu0 %v4600_v11  ;;  %v2789_v55 = vpop.f32.mrf.mxu1  ;;  %v2620_v11 = vadd.f32 %v2619_v36, %v2577_v4 }
 0x1f8   :  { %3927 = vmatprep.subr.bf16.mxu0 %v4601_v12  ;;  %3966 = vmatpush3.bf16.msra.mxu1 %v4614_v26  ;;  %v2748_v58 = vpop.f32.mrf.mxu0  ;;  %v2661_v12 = vadd.f32 %v2660_v41, %v2618_v6 }
 0x1f9   :  { %3967 = vmatprep.subr.bf16.mxu1 %v4856_v25  ;;  %v2791_v59 = vpop.f32.mrf.mxu1 }
 0x1fb   :  { %3928 = vmatpush3.bf16.msra.mxu0 %v4602_v13  ;;  %v2702_v13 = vadd.f32 %v2701_v40, %v2659_v7 }
 0x1fc   :  { %3929 = vmatprep.subr.bf16.mxu0 %v4603_v14  ;;  %3968 = vmatpush3.bf16.msra.mxu1 %v4615_v27  ;;  %v2663_v14 = vadd.f32 %v2662_v43, %v2620_v11  ;;  %v4617_v11 = vld [vmem:[#allocation11 + $0x18] sm:$0xff]  }
 0x1fd   :  { %3969 = vmatprep.subr.bf16.mxu1 %v4856_v25 }
 0x1ff   :  { %3930 = vmatpush3.bf16.msra.mxu0 %v4604_v15  ;;  %v2700_v15 = vadd.f32 %v2699_v38, %v2657_v8 }
 0x200   :  { %3931 = vmatprep.subr.bf16.mxu0 %v4605_v16  ;;  %3970 = vmatpush3.bf16.msra.mxu1 %v4616_v28 }
 0x201   :  { %3971 = vmatprep.subr.bf16.mxu1 %v4856_v25 }
 0x203   :  { %3932 = vmatpush3.bf16.msra.mxu0 %v4606_v17 }
 0x204   :  { %3933 = vmatprep.subr.bf16.mxu0 %v4607_v18  ;;  %v2704_v18 = vadd.f32 %v2703_v42, %v2661_v12  ;;  %3972 = vmatpush3.bf16.msra.mxu1 %v4617_v11  ;;  %v4618_v12 = vld [vmem:[#allocation11 + $0x10] sm:$0xff]  }
 0x205   :  { %3973 = vmatprep.subr.bf16.mxu1 %v4856_v25 }
 0x206   :  { %v2747_v24 = vadd.f32 %v2746_v54, %v2704_v18  ;;  %v4624_v18 = vld [vmem:[#allocation14 + $0x20] sm:$0xff]  }
 0x207   :  { %3934 = vmatpush3.bf16.msra.mxu0 %v4608_v19  ;;  %v2745_v19 = vadd.f32 %v2744_v49, %v2702_v13  ;;  %v4619_v13 = vld [vmem:[#allocation11 + $0x8] sm:$0xff]  }
 0x208   :  { %3935 = vmatprep.subr.bf16.mxu0 %v4609_v20  ;;  %v2743_v20 = vadd.f32 %v2742_v46, %v2700_v15  ;;  %v2790_v31 = vadd.f32 %v2789_v55, %v2747_v24  ;;  %3974 = vmatpush3.bf16.msra.mxu1 %v4618_v12  ;;  %v4621_v15 = vld [vmem:[#allocation14 + $0x38] sm:$0xff]  }
 0x209   :  { %v2788_v26 = vadd.f32 %v2787_v50, %v2745_v19  ;;  %3975 = vmatprep.subr.bf16.mxu1 %v4856_v25  ;;  %v4625_v19 = vld [vmem:[#allocation14 + $0x18] sm:$0xff]  }
 0x20a   :  { %v2786_v28 = vadd.f32 %v2785_v47, %v2743_v20 }
 0x20b   :  { %3936 = vmatpush3.bf16.msra.mxu0 %v4610_v21 }
 0x20c   :  { %3937 = vmatprep.subr.bf16.mxu0 %v4611_v22  ;;  %3976 = vmatpush3.bf16.msra.mxu1 %v4619_v13 }
 0x20d   :  { %3977 = vmatprep.subr.bf16.mxu1 %v4856_v25 }
 0x20f   :  { %3938 = vmatpush3.bf16.msra.mxu0 %v4612_v23  ;;  %v2706_v23 = vadd.f32 %v2705_v44, %v2663_v14  ;;  %v4620_v14 = vld [vmem:[#allocation11] sm:$0xff]  }
 0x210   :  { %3983 = vmatprep.subr.bf16.mxu0 %v4856_v25  ;;  %3978 = vmatpush3.bf16.msra.mxu1 %v4620_v14 }
 0x211   :  { %v2749_v27 = vadd.f32 %v2748_v58, %v2706_v23  ;;  %v3879_v23 = vld [vmem:[#allocation10] ss:$0 sm:$0xff] }
 0x213   :  { %v2792_v34 = vadd.f32 %v2791_v59, %v2749_v27 }
 0x232   :  { %v2828_v60 = vpop.f32.mrf.mxu0 }
 0x233   :  { %v2871_v61 = vpop.f32.mrf.mxu1  ;;  %v2829_v33 = vadd.f32 %v2828_v60, %v2786_v28 }
 0x234   :  { %v2830_v1 = vpop.f32.mrf.mxu0 }
 0x235   :  { %v2873_v2 = vpop.f32.mrf.mxu1  ;;  %v2831_v32 = vadd.f32 %v2830_v1, %v2788_v26  ;;  %v2872_v40 = vadd.f32 %v2871_v61, %v2829_v33  ;;  %v4626_v33 = vld [vmem:[#allocation14 + $0x10] sm:$0xff]  }
 0x236   :  { %v2832_v9 = vpop.f32.mrf.mxu0 }
 0x237   :  { %v2875_v10 = vpop.f32.mrf.mxu1  ;;  %v2833_v35 = vadd.f32 %v2832_v9, %v2790_v31  ;;  %v2874_v38 = vadd.f32 %v2873_v2, %v2831_v32 }
 0x238   :  { %v2834_v16 = vpop.f32.mrf.mxu0 }
 0x239   :  { %v2877_v17 = vpop.f32.mrf.mxu1  ;;  %v2835_v39 = vadd.f32 %v2834_v16, %v2792_v34  ;;  %v2876_v41 = vadd.f32 %v2875_v10, %v2833_v35  ;;  %v4622_v16 = vld [vmem:[#allocation14 + $0x30] sm:$0xff]   ;;  %v4627_v34 = vld [vmem:[#allocation14 + $0x8] sm:$0xff]   ;;  %v4628_v35 = vld [vmem:[#allocation14] sm:$0xff]  }
 0x23b   :  { %v2878_v46 = vadd.f32 %v2877_v17, %v2835_v39  ;;  %v4623_v17 = vld [vmem:[#allocation14 + $0x28] sm:$0xff]  }
 0x272   :  { %v2914_v21 = vpop.f32.mrf.mxu0 }
 0x273   :  { %v2957_v22 = vpop.f32.mrf.mxu1  ;;  %v2915_v43 = vadd.f32 %v2914_v21, %v2872_v40 }
 0x274   :  { %v2916_v29 = vpop.f32.mrf.mxu0 }
 0x275   :  { %v2959_v30 = vpop.f32.mrf.mxu1  ;;  %v2917_v42 = vadd.f32 %v2916_v29, %v2874_v38  ;;  %v2958_v52 = vadd.f32 %v2957_v22, %v2915_v43 }
 0x276   :  { %v2918_v36 = vpop.f32.mrf.mxu0 }
 0x277   :  { %v2961_v37 = vpop.f32.mrf.mxu1  ;;  %v2919_v48 = vadd.f32 %v2918_v36, %v2876_v41  ;;  %v2960_v50 = vadd.f32 %v2959_v30, %v2917_v42  ;;  %v3896_v36 = vld [vmem:[#allocation13] ss:$0 sm:$0xff] }
 0x278   :  { %v2920_v44 = vpop.f32.mrf.mxu0 }
 0x279   :  { %v2963_v45 = vpop.f32.mrf.mxu1  ;;  %v2921_v51 = vadd.f32 %v2920_v44, %v2878_v46  ;;  %v2962_v55 = vadd.f32 %v2961_v37, %v2919_v48  ;;  %v3905_v48 = vld [vmem:[#allocation16] ss:$0 sm:$0xff] }
 0x27b   :  { %v2964_v60 = vadd.f32 %v2963_v45, %v2921_v51 }
 0x2b2   :  { %v3000_v47 = vpop.f32.mrf.mxu0 }
 0x2b3   :  { %v3043_v49 = vpop.f32.mrf.mxu1  ;;  %v3001_v57 = vadd.f32 %v3000_v47, %v2958_v52 }
 0x2b4   :  { %v3002_v53 = vpop.f32.mrf.mxu0 }
 0x2b5   :  { %v3045_v54 = vpop.f32.mrf.mxu1  ;;  %v3003_v56 = vadd.f32 %v3002_v53, %v2960_v50  ;;  %v3044_v2 = vadd.f32 %v3043_v49, %v3001_v57 }
 0x2b6   :  { %v3004_v58 = vpop.f32.mrf.mxu0 }
 0x2b7   :  { %v3047_v59 = vpop.f32.mrf.mxu1  ;;  %v3005_v61 = vadd.f32 %v3004_v58, %v2962_v55  ;;  %v3046_v63 = vadd.f32 %v3045_v54, %v3003_v56  ;;  %v3052_v8 = vmax.f32 %v3044_v2, 0.0 }
 0x2b8   :  { %v3006_v62 = vpop.f32.mrf.mxu0 }
 0x2b9   :  { %v3048_v0 = vadd.f32 %v3047_v59, %v3005_v61  ;;  %v3007_v1 = vadd.f32 %v3006_v62, %v2964_v60  ;;  %v3049_v3 = vpop.f32.mrf.mxu1  ;;  %v3053_v6 = vmax.f32 %v3046_v63, 0.0 }
 0x2bb   :  { %v3050_v4 = vadd.f32 %v3049_v3, %v3007_v1  ;;  %v3054_v5 = vmax.f32 %v3048_v0, 0.0 }
 0x2bd   :  { %v3055_v7 = vmax.f32 %v3050_v4, 0.0  ;;  %v3056_v10 = vpack.c.bf16 %v3054_v5, %v3052_v8 }
 0x2bf   :  { %v3057_v9 = vpack.c.bf16 %v3055_v7, %v3053_v6 }
 0x2c1   :  { %3225 = vmatprep.mubr.bf16.mxu0 %v3057_v9 }
 0x2c2   :  { %3226 = vmatmul.mubr.bf16.vlgmr.msra.gmra.mxu0 %v3056_v10 }
 0x2c3   :  { %3999 = vmatprep.mubr.msk.bf16.mxu0 %vm4857_vm0, %v4856_v25  ;;  %3984 = vmatpush3.bf16.msra.mxu0 %v4621_v15 }
 0x2c4   :  { %3985 = vmatprep.subr.bf16.mxu0 %v4856_v25 }
 0x2c7   :  { %3986 = vmatpush3.bf16.msra.mxu0 %v4622_v16 }
 0x2c8   :  { %3987 = vmatprep.subr.bf16.mxu0 %v4856_v25 }
 0x2cb   :  { %3988 = vmatpush3.bf16.msra.mxu0 %v4623_v17 }
 0x2cc   :  { %3989 = vmatprep.subr.bf16.mxu0 %v4856_v25 }
 0x2cf   :  { %3990 = vmatpush3.bf16.msra.mxu0 %v4624_v18 }
 0x2d0   :  { %3991 = vmatprep.subr.bf16.mxu0 %v4856_v25 }
 0x2d3   :  { %3992 = vmatpush3.bf16.msra.mxu0 %v4625_v19 }
 0x2d4   :  { %3993 = vmatprep.subr.bf16.mxu0 %v4856_v25 }
 0x2d7   :  { %3994 = vmatpush3.bf16.msra.mxu0 %v4626_v33 }
 0x2d8   :  { %3995 = vmatprep.subr.bf16.mxu0 %v4856_v25 }
 0x2db   :  { %3996 = vmatpush3.bf16.msra.mxu0 %v4627_v34 }
 0x2dc   :  { %3997 = vmatprep.subr.bf16.mxu0 %v4856_v25 }
 0x2df   :  { %3998 = vmatpush3.bf16.msra.mxu0 %v4628_v35 }
 0x382   :  { %v3939_v20 = vpop.f32.mrf.mxu0 }
 0x384   :  { %v3940_v21 = vpop.f32.mrf.mxu0 }
 0x385   :  { %v3941_v22 = vadd.f32 %v3940_v21, %v3939_v20 }
 0x386   :  { %v3942_v24 = vpop.f32.mrf.mxu0 }
 0x387   :  { %v3228_v27 = vadd.f32 %v3941_v22, %v3879_v23 }
 0x388   :  { %v3943_v26 = vpop.f32.mrf.mxu0 }
 0x389   :  { %v3944_v28 = vadd.f32 %v3943_v26, %v3942_v24  ;;  %v3234_v30 = vmax.f32 %v3228_v27, 0.0 }
 0x38b   :  { %v3231_v29 = vadd.f32 %v3944_v28, %v3879_v23 }
 0x38d   :  { %v3235_v31 = vmax.f32 %v3231_v29, 0.0 }
 0x38f   :  { %v3236_v32 = vpack.c.bf16 %v3235_v31, %v3234_v30 }
 0x391   :  { %3980 = vmatmul.mubr.bf16.vlgmr.msra.gmra.mxu1 %v3236_v32 }
 0x451   :  { %v3342_v37 = vpop.f32.mrf.mxu1 }
 0x452   :  { %v3343_v39 = vadd.f32 %v3896_v36, %v3342_v37 }
 0x453   :  { %v3981_v38 = vpop.f32.mrf.mxu1 }
 0x454   :  { %v3349_v43 = vmax.f32 %v3343_v39, 0.0 }
 0x455   :  { %v3345_v40 = vpop.f32.mrf.mxu1 }
 0x456   :  { %v3346_v41 = vadd.f32 %v3896_v36, %v3345_v40 }
 0x457   :  { %v3982_v42 = vpop.f32.mrf.mxu1 }
 0x458   :  { %v3350_v44 = vmax.f32 %v3346_v41, 0.0 }
 0x45a   :  { %v3351_v45 = vpack.c.bf16 %v3350_v44, %v3349_v43 }
 0x45c   :  { %4000 = vmatmul.mubr.bf16.vlgmr.msra.gmra.mxu0 %v3351_v45 }
 0x51c   :  { %v3457_v46 = vpop.f32.mrf.mxu0 }
 0x51d   :  { %v3458_v25 = vadd.f32 %v3905_v48, %v3457_v46 }
 0x51e   :  { %v4001_v47 = vpop.f32.mrf.mxu0 }
 0x520   :  { %v3460_v49 = vpop.f32.mrf.mxu0 }
 0x521   :  { %v3461_v50 = vadd.f32 %v3905_v48, %v3460_v49 }
 0x522   :  { %v4002_v51 = vpop.f32.mrf.mxu0 }
 0x523   :  { %v3921_v52 = vpack.c.bf16 %v3461_v50, %v3458_v25 }
 0x525   :  { %3922 = vst [vmem:[#allocation17] sm:$0xff] %v3921_v52  }
 0x526   :  { %4820 = shalt.err (!%p4817_p7)
}
 0x527   :  { %3485 = dma.vmem_to_hbm [thread:$0]  %s3480_s8, 128, %s4978_s9, [#allocation4], %s4845_s19, %s4845_s19, %s4846_s20  }
 0x528   :  { %4839 = dma.done.wait [#allocation4], 128  }
 0x529   :  { %4840 = vsyncadd [#allocation4], 4294967168 }
 0x52a   :  { %3489 = vsyncpa [#allocation3], 1 }
 0x52b   :  { %3490 = vsyncpa [#allocation6], 1 }
 0x52c   :  { %3491 = vsyncpa [#allocation9], 1 }
 0x52d   :  { %3492 = vsyncpa [#allocation12], 1 }
 0x52e   :  { %3493 = vsyncpa [#allocation15], 1 }
 0x52f   :  { %3494 = vsyncpa [#allocation4], 1 }

</bundles_post_ra>
